<compile_context>
chip_gen: v5e
topology: v5e:2x2
jax: 0.10.0
libtpu: 0.0.40
codegen_flags: <defaults>
</compile_context>

<pallas_src>
import functools

import jax
import jax.numpy as jnp
from jax.experimental import pallas as pl
from jax.experimental.pallas import tpu as pltpu
from jax.scipy.linalg import block_diag

EMBED_DIM = 16
NUM_HEADS = 2
HEAD_DIM = EMBED_DIM // NUM_HEADS
TRANSE_DIM = 32
HIDDEN = 64
NUM_CLASSES = 3
BN_EPS = 1e-5
LANE = 128
OUT_ROWS = 8                      # class logits padded to a full 8-sublane tile
SCALE = 1.0 / (HEAD_DIM ** 0.5)


# ---------------------------------------------------------------------------
# In-kernel helpers (pure jnp / pl, traced inside the Pallas kernel body).
# ---------------------------------------------------------------------------
def _mm(w, x):
    """(M, K) @ (K, TB) MXU matmul with f32 accumulation."""
    return jnp.dot(w, x, preferred_element_type=jnp.float32)


def _mha(q_list, k_list, v_list, w_out, b_out):
    """nn.MultiheadAttention core in feature-major layout.

    q/k/v are already in-projected (E, TB) slabs; returns one (E, TB)
    attention output (after out_proj) per query position.
    """
    outs = []
    for q in q_list:
        heads = []
        for h in range(NUM_HEADS):
            rs = slice(h * HEAD_DIM, (h + 1) * HEAD_DIM)
            qh = q[rs]                                              # (HD, TB)
            scores = [jnp.sum(qh * k[rs], axis=0, keepdims=True) * SCALE
                      for k in k_list]                              # each (1, TB)
            m = scores[0]
            for s in scores[1:]:
                m = jnp.maximum(m, s)
            exps = [jnp.exp(s - m) for s in scores]
            denom = exps[0]
            for e in exps[1:]:
                denom = denom + e
            inv = pl.reciprocal(denom, approx=True)                 # one EUP op per head
            ctx = (exps[0] * inv) * v_list[0][rs]
            for e, v in zip(exps[1:], v_list[1:]):
                ctx = ctx + (e * inv) * v[rs]
            heads.append(ctx)                                       # (HD, TB)
        ctx_full = jnp.concatenate(heads, axis=0)                   # sublane concat
        outs.append(_mm(w_out, ctx_full) + b_out)
    return outs


# ---------------------------------------------------------------------------
# Pallas kernel: one batch tile (TB lanes) per grid step.
# ---------------------------------------------------------------------------
def kg_kernel(x_ref, te_ref, slab_ref, out_ref, *, offs):
    E = EMBED_DIM

    def P(name):
        r0, r, c = offs[name]
        return slab_ref[r0:r0 + r, :][:, :c]

    x = x_ref[...]                                                  # (3, TB)
    te = te_ref[...]                                                # (32, TB)

    # --- scalar encoders: VPU broadcast FMA + ReLU (no K=1 matmuls) --------
    w_enc, b_enc = P("w_enc"), P("b_enc")                           # (16, 3)
    ehr_f = jnp.maximum(w_enc[:, 0:1] * x[0:1, :] + b_enc[:, 0:1], 0.0)
    img_f = jnp.maximum(w_enc[:, 1:2] * x[1:2, :] + b_enc[:, 1:2], 0.0)
    bio_f = jnp.maximum(w_enc[:, 2:3] * x[2:3, :] + b_enc[:, 2:3], 0.0)

    transe = _mm(P("w_transe"), te) + P("b_transe")                 # (16, TB)

    # --- modality q/k/v projections, fused per source tensor ---------------
    p_bio = _mm(P("w_bio3"), bio_f) + P("b_bio3")                   # [Qa0;Ka0;Va0]
    p_ehr = _mm(P("w_ehr3"), ehr_f) + P("b_ehr3")                   # [Qb0;Kb0;Vb0]
    qc0 = _mm(P("w_imgq"), img_f) + P("b_imgq")                     # Qc0
    p_t = _mm(P("w_t7"), transe) + P("b_t7")                        # 7 projections of transe
    # NOTE: img_k / img_v are computed by the PyTorch module but never consumed
    # by its forward pass, so they are elided.

    # --- MHA in-projection, fused via block-diagonal [Wq;Wk;Wv] weights ----
    ip_bio = _mm(P("bd3"), p_bio) + P("b_in3")
    ip_ehr = _mm(P("bd3"), p_ehr) + P("b_in3")
    ip_t = _mm(P("bd7"), p_t) + P("b_in7")
    ipq_c0 = _mm(P("w_inq"), qc0) + P("b_inq")

    w_out, b_out = P("w_out"), P("b_out")

    q_a = [ip_bio[0:E],         ip_t[0:E]]
    k_a = [ip_bio[E:2 * E],     ip_t[E:2 * E]]
    v_a = [ip_bio[2 * E:3 * E], ip_t[2 * E:3 * E]]
    q_b = [ip_ehr[0:E],         ip_t[3 * E:4 * E]]
    k_b = [ip_ehr[E:2 * E],     ip_t[4 * E:5 * E]]
    v_b = [ip_ehr[2 * E:3 * E], ip_t[5 * E:6 * E]]
    q_c = [ipq_c0,              ip_t[6 * E:7 * E]]

    bio_ehr = _mha(q_a, k_b, v_b, w_out, b_out)                     # 2 x (16, TB)
    ehr_bio = _mha(q_b, k_a, v_a, w_out, b_out)                     # 2 x (16, TB)

    ab_in = jnp.concatenate([bio_ehr[0], bio_ehr[1],
                             ehr_bio[0], ehr_bio[1]], axis=0)       # (64, TB)
    ab = _mm(P("w_ab"), ab_in) + P("b_ab")                          # (16, TB)

    ip_ab = _mm(P("w_inkv"), ab) + P("b_inkv")                      # [k(ab); v(ab)]
    img_ab = _mha(q_c, [ip_ab[0:E]], [ip_ab[E:2 * E]], w_out, b_out)
    img_mean = (img_ab[0] + img_ab[1]) * 0.5                        # mean over seq dim

    final = jnp.concatenate([ab, img_mean, transe], axis=0)         # (48, TB)
    h = _mm(P("w_f1"), final) + P("b_f1")                           # (64, TB)
    h = jnp.maximum(h * P("bn_scale") + P("bn_shift"), 0.0)         # eval BN + ReLU
    # eval-mode Dropout(0.2) == identity
    out_ref[...] = _mm(P("w_f2"), h) + P("b_f2")                    # (8, TB), rows 3..7 zero


# ---------------------------------------------------------------------------
# Wrapper: layout change, batch grid, lane-dense output.
# ---------------------------------------------------------------------------
def kg_forward(x, transe_embed, slab, offsets, *, batch_tile=None):
    B = x.shape[0]
    if batch_tile is None:
        # >=512 amortizes per-grid-step overhead; small batches use one tile.
        batch_tile = 512 if B >= 512 else max(LANE, ((B + LANE - 1) // LANE) * LANE)
    TB = batch_tile
    n_tiles = (B + TB - 1) // TB
    b_pad = n_tiles * TB

    x_t = jnp.zeros((3, b_pad), jnp.float32).at[:, :B].set(x.T.astype(jnp.float32))
    te_t = jnp.zeros((TRANSE_DIM, b_pad), jnp.float32).at[:, :B].set(
        transe_embed.T.astype(jnp.float32))

    kernel = functools.partial(kg_kernel, offs=offsets)
    out = pl.pallas_call(
        kernel,
        out_shape=jax.ShapeDtypeStruct((OUT_ROWS, b_pad), jnp.float32),
        grid=(n_tiles,),
        in_specs=[
            pl.BlockSpec((3, TB), lambda i: (0, i)),
            pl.BlockSpec((TRANSE_DIM, TB), lambda i: (0, i)),
            # Packed parameter slab: single block + constant index_map keeps it
            # VMEM-resident across all batch tiles (no per-step re-DMA).
            pl.BlockSpec(slab.shape, lambda i: (0, 0)),
        ],
        out_specs=pl.BlockSpec((OUT_ROWS, TB), lambda i: (0, i)),
        compiler_params=pltpu.CompilerParams(
            dimension_semantics=("parallel",)),      # 2x on v7x's two TCs
    )(x_t, te_t, slab)
    # drop padded sublanes / lanes; back to the user-facing (B, 3) layout
    return out[:NUM_CLASSES, :B].T


# ---------------------------------------------------------------------------
# Parameters: original (torch-convention) params + kernel preparation/packing.
# ---------------------------------------------------------------------------
def init_params(key):
    """Random parameters in PyTorch convention: Linear weight = (out, in)."""
    keys = iter(jax.random.split(key, 64))

    def nrm(shape, scale=0.2):
        return (scale * jax.random.normal(next(keys), shape)).astype(jnp.float32)

    p = {}
    for mod in ("ehr", "img", "bio"):
        p[f"{mod}_w"] = nrm((EMBED_DIM, 1))
        p[f"{mod}_b"] = nrm((EMBED_DIM,), 0.1)
    p["transe_w"] = nrm((EMBED_DIM, TRANSE_DIM))
    p["transe_b"] = nrm((EMBED_DIM,), 0.1)
    for mod in ("bio", "ehr", "img"):
        for r in ("q", "k", "v"):                    # img_k / img_v exist but are unused
            p[f"{mod}_{r}_w"] = nrm((EMBED_DIM, EMBED_DIM))
            p[f"{mod}_{r}_b"] = nrm((EMBED_DIM,), 0.1)
    p["in_w"] = nrm((3 * EMBED_DIM, EMBED_DIM))      # MHA in_proj_weight [Wq;Wk;Wv]
    p["in_b"] = nrm((3 * EMBED_DIM,), 0.1)
    p["out_w"] = nrm((EMBED_DIM, EMBED_DIM))         # MHA out_proj
    p["out_b"] = nrm((EMBED_DIM,), 0.1)
    p["ab_w"] = nrm((EMBED_DIM, 4 * EMBED_DIM))
    p["ab_b"] = nrm((EMBED_DIM,), 0.1)
    p["f1_w"] = nrm((HIDDEN, 3 * EMBED_DIM))
    p["f1_b"] = nrm((HIDDEN,), 0.1)
    p["bn_gamma"] = 1.0 + nrm((HIDDEN,), 0.1)
    p["bn_beta"] = nrm((HIDDEN,), 0.1)
    p["bn_mean"] = nrm((HIDDEN,), 0.1)
    p["bn_var"] = 1.0 + jnp.abs(nrm((HIDDEN,), 0.5))
    p["f2_w"] = nrm((NUM_CLASSES, HIDDEN))
    p["f2_b"] = nrm((NUM_CLASSES,), 0.1)
    return p


def prepare_params(p):
    """Build fused feature-major weights and pack them into one VMEM slab."""
    E = EMBED_DIM
    Wq, Wk, Wv = p["in_w"][:E], p["in_w"][E:2 * E], p["in_w"][2 * E:]
    bq = p["in_b"][:E]
    bn_scale = p["bn_gamma"] / jnp.sqrt(p["bn_var"] + BN_EPS)
    bn_shift = p["bn_beta"] - p["bn_mean"] * bn_scale
    col = lambda v: v[:, None]

    entries = [
        ("w_enc", jnp.concatenate([p["ehr_w"], p["img_w"], p["bio_w"]], axis=1)),
        ("b_enc", jnp.stack([p["ehr_b"], p["img_b"], p["bio_b"]], axis=1)),
        ("w_transe", p["transe_w"]),
        ("b_transe", col(p["transe_b"])),
        ("w_bio3", jnp.concatenate([p["bio_q_w"], p["bio_k_w"], p["bio_v_w"]], axis=0)),
        ("b_bio3", col(jnp.concatenate([p["bio_q_b"], p["bio_k_b"], p["bio_v_b"]]))),
        ("w_ehr3", jnp.concatenate([p["ehr_q_w"], p["ehr_k_w"], p["ehr_v_w"]], axis=0)),
        ("b_ehr3", col(jnp.concatenate([p["ehr_q_b"], p["ehr_k_b"], p["ehr_v_b"]]))),
        ("w_imgq", p["img_q_w"]),
        ("b_imgq", col(p["img_q_b"])),
        ("w_t7", jnp.concatenate([p["bio_q_w"], p["bio_k_w"], p["bio_v_w"],
                                  p["ehr_q_w"], p["ehr_k_w"], p["ehr_v_w"],
                                  p["img_q_w"]], axis=0)),
        ("b_t7", col(jnp.concatenate([p["bio_q_b"], p["bio_k_b"], p["bio_v_b"],
                                      p["ehr_q_b"], p["ehr_k_b"], p["ehr_v_b"],
                                      p["img_q_b"]]))),
        ("bd3", block_diag(Wq, Wk, Wv)),
        ("b_in3", col(p["in_b"])),
        ("bd7", block_diag(Wq, Wk, Wv, Wq, Wk, Wv, Wq)),
        ("b_in7", col(jnp.concatenate([p["in_b"], p["in_b"], bq]))),
        ("w_inq", Wq),
        ("b_inq", col(bq)),
        ("w_inkv", p["in_w"][E:3 * E]),
        ("b_inkv", col(p["in_b"][E:3 * E])),
        ("w_out", p["out_w"]),
        ("b_out", col(p["out_b"])),
        ("w_ab", p["ab_w"]),
        ("b_ab", col(p["ab_b"])),
        ("w_f1", p["f1_w"]),
        ("b_f1", col(p["f1_b"])),
        ("bn_scale", col(bn_scale)),
        ("bn_shift", col(bn_shift)),
        ("w_f2", jnp.zeros((OUT_ROWS, HIDDEN), jnp.float32).at[:NUM_CLASSES].set(p["f2_w"])),
        ("b_f2", col(jnp.zeros((OUT_ROWS,), jnp.float32).at[:NUM_CLASSES].set(p["f2_b"]))),
    ]

    offsets = {}
    blocks = []
    row = 0
    for name, a in entries:
        a = jnp.asarray(a, jnp.float32)
        r, c = a.shape
        r_pad = ((r + 7) // 8) * 8
        blocks.append(jnp.zeros((r_pad, LANE), jnp.float32).at[:r, :c].set(a))
        offsets[name] = (row, r, c)
        row += r_pad
    slab = jnp.concatenate(blocks, axis=0)
    return slab, offsets


# ---------------------------------------------------------------------------
# Pure-JAX reference mirroring the PyTorch eval-mode forward (unfused params).
# ---------------------------------------------------------------------------
def forward_reference(x, transe_embed, p):
    E, HD = EMBED_DIM, HEAD_DIM
    lin = lambda v, w, b: v @ w.T + b
    relu = lambda v: jnp.maximum(v, 0.0)

    ehr_f = relu(lin(x[:, 0:1], p["ehr_w"], p["ehr_b"]))
    img_f = relu(lin(x[:, 1:2], p["img_w"], p["img_b"]))
    bio_f = relu(lin(x[:, 2:3], p["bio_w"], p["bio_b"]))
    transe = lin(transe_embed, p["transe_w"], p["transe_b"])

    bio_seq, ehr_seq, img_seq = [bio_f, transe], [ehr_f, transe], [img_f, transe]
    proj = lambda seq, n: [lin(t, p[f"{n}_w"], p[f"{n}_b"]) for t in seq]
    Qa, Ka, Va = proj(bio_seq, "bio_q"), proj(bio_seq, "bio_k"), proj(bio_seq, "bio_v")
    Qb, Kb, Vb = proj(ehr_seq, "ehr_q"), proj(ehr_seq, "ehr_k"), proj(ehr_seq, "ehr_v")
    Qc = proj(img_seq, "img_q")

    Wq, Wk, Wv = p["in_w"][:E], p["in_w"][E:2 * E], p["in_w"][2 * E:]
    bq, bk, bv = p["in_b"][:E], p["in_b"][E:2 * E], p["in_b"][2 * E:]

    def mha(q_list, k_list, v_list):
        qs = [lin(t, Wq, bq) for t in q_list]
        ks = [lin(t, Wk, bk) for t in k_list]
        vs = [lin(t, Wv, bv) for t in v_list]
        outs = []
        for q in qs:
            heads = []
            for h in range(NUM_HEADS):
                sl = slice(h * HD, (h + 1) * HD)
                scores = jnp.stack([jnp.sum(q[:, sl] * k[:, sl], axis=-1)
                                    for k in ks], axis=-1) / (HD ** 0.5)
                w = jax.nn.softmax(scores, axis=-1)
                ctx = sum(w[:, j:j + 1] * vs[j][:, sl] for j in range(len(vs)))
                heads.append(ctx)
            outs.append(lin(jnp.concatenate(heads, axis=-1), p["out_w"], p["out_b"]))
        return outs

    bio_ehr = mha(Qa, Kb, Vb)
    ehr_bio = mha(Qb, Ka, Va)
    ab = lin(jnp.concatenate([bio_ehr[0], bio_ehr[1], ehr_bio[0], ehr_bio[1]], axis=-1),
             p["ab_w"], p["ab_b"])
    img_ab = mha(Qc, [ab], [ab])
    img_mean = (img_ab[0] + img_ab[1]) * 0.5
    final = jnp.concatenate([ab, img_mean, transe], axis=-1)
    h = lin(final, p["f1_w"], p["f1_b"])
    h = (h - p["bn_mean"]) / jnp.sqrt(p["bn_var"] + BN_EPS) * p["bn_gamma"] + p["bn_beta"]
    h = relu(h)
    return lin(h, p["f2_w"], p["f2_b"])


if __name__ == "__main__":
    key = jax.random.PRNGKey(0)
    k_x, k_te, k_p = jax.random.split(key, 3)

    B = 4
    x = jax.random.normal(k_x, (B, 3), dtype=jnp.float32)
    transe_embed = jax.random.normal(k_te, (B, TRANSE_DIM), dtype=jnp.float32)

    params = init_params(k_p)
    slab, offsets = prepare_params(params)

    out = jax.block_until_ready(kg_forward(x, transe_embed, slab, offsets))
    assert out.shape == (B, NUM_CLASSES), out.shape

    ref = jax.block_until_ready(forward_reference(x, transe_embed, params))
    # approx reciprocal + folded BN perturb low bits only
    assert jnp.allclose(out, ref, rtol=5e-3, atol=5e-3), float(jnp.max(jnp.abs(out - ref)))

    print("KERNEL_OK")
</pallas_src>

<mosaic_0001>
module attributes {stable_mosaic.version = 11 : i64} {
  func.func @kg_kernel(%arg0: i32, %arg1: memref<3x128xf32, #tpu.memory_space<vmem>>, %arg2: memref<32x128xf32, #tpu.memory_space<vmem>>, %arg3: memref<1264x128xf32, #tpu.memory_space<vmem>>, %arg4: memref<8x128xf32, #tpu.memory_space<vmem>>) attributes {dimension_semantics = [#tpu.dimension_semantics<parallel>], iteration_bounds = array<i64: 1>, scalar_prefetch = 0 : i64, scratch_operands = 0 : i64, tpu.core_type = #tpu.core_type<tc>, window_params = [{transform_indices = @transform_0, window_bounds = array<i64: 3, 128>}, {transform_indices = @transform_1, window_bounds = array<i64: 32, 128>}, {pipeline_mode = #tpu.pipeline_mode<synchronous>, transform_indices = @transform_2, window_bounds = array<i64: 1264, 128>}, {transform_indices = @transform_3, window_bounds = array<i64: 8, 128>}]} {
    %c0 = arith.constant 0 : index
    %c0_0 = arith.constant 0 : index
    %0 = vector.load %arg1[%c0, %c0_0] : memref<3x128xf32, #tpu.memory_space<vmem>>, vector<3x128xf32>
    %c0_1 = arith.constant 0 : index
    %c0_2 = arith.constant 0 : index
    %1 = vector.load %arg2[%c0_1, %c0_2] : memref<32x128xf32, #tpu.memory_space<vmem>>, vector<32x128xf32>
    %c0_3 = arith.constant 0 : index
    %c0_4 = arith.constant 0 : index
    %2 = vector.load %arg3[%c0_3, %c0_4] : memref<1264x128xf32, #tpu.memory_space<vmem>>, vector<16x128xf32>
    %3 = vector.extract_strided_slice %2 {offsets = [0, 0], sizes = [16, 3], strides = [1, 1]} : vector<16x128xf32> to vector<16x3xf32>
    %c16 = arith.constant 16 : index
    %c0_5 = arith.constant 0 : index
    %4 = vector.load %arg3[%c16, %c0_5] : memref<1264x128xf32, #tpu.memory_space<vmem>>, vector<16x128xf32>
    %5 = vector.extract_strided_slice %4 {offsets = [0, 0], sizes = [16, 3], strides = [1, 1]} : vector<16x128xf32> to vector<16x3xf32>
    %6 = vector.extract_strided_slice %3 {offsets = [0, 0], sizes = [16, 1], strides = [1, 1]} : vector<16x3xf32> to vector<16x1xf32>
    %7 = vector.extract_strided_slice %0 {offsets = [0, 0], sizes = [1, 128], strides = [1, 1]} : vector<3x128xf32> to vector<1x128xf32>
    %8 = vector.broadcast %6 : vector<16x1xf32> to vector<16x128xf32>
    %9 = vector.broadcast %7 : vector<1x128xf32> to vector<16x128xf32>
    %10 = arith.mulf %8, %9 : vector<16x128xf32>
    %11 = vector.extract_strided_slice %5 {offsets = [0, 0], sizes = [16, 1], strides = [1, 1]} : vector<16x3xf32> to vector<16x1xf32>
    %12 = vector.broadcast %11 : vector<16x1xf32> to vector<16x128xf32>
    %13 = arith.addf %10, %12 : vector<16x128xf32>
    %cst = arith.constant 0.000000e+00 : f32
    %14 = vector.broadcast %cst : f32 to vector<16x128xf32>
    %15 = arith.maximumf %13, %14 : vector<16x128xf32>
    %16 = vector.extract_strided_slice %3 {offsets = [0, 1], sizes = [16, 1], strides = [1, 1]} : vector<16x3xf32> to vector<16x1xf32>
    %17 = vector.extract_strided_slice %0 {offsets = [1, 0], sizes = [1, 128], strides = [1, 1]} : vector<3x128xf32> to vector<1x128xf32>
    %18 = vector.broadcast %16 : vector<16x1xf32> to vector<16x128xf32>
    %19 = vector.broadcast %17 : vector<1x128xf32> to vector<16x128xf32>
    %20 = arith.mulf %18, %19 : vector<16x128xf32>
    %21 = vector.extract_strided_slice %5 {offsets = [0, 1], sizes = [16, 1], strides = [1, 1]} : vector<16x3xf32> to vector<16x1xf32>
    %22 = vector.broadcast %21 : vector<16x1xf32> to vector<16x128xf32>
    %23 = arith.addf %20, %22 : vector<16x128xf32>
    %cst_6 = arith.constant 0.000000e+00 : f32
    %24 = vector.broadcast %cst_6 : f32 to vector<16x128xf32>
    %25 = arith.maximumf %23, %24 : vector<16x128xf32>
    %26 = vector.extract_strided_slice %3 {offsets = [0, 2], sizes = [16, 1], strides = [1, 1]} : vector<16x3xf32> to vector<16x1xf32>
    %27 = vector.extract_strided_slice %0 {offsets = [2, 0], sizes = [1, 128], strides = [1, 1]} : vector<3x128xf32> to vector<1x128xf32>
    %28 = vector.broadcast %26 : vector<16x1xf32> to vector<16x128xf32>
    %29 = vector.broadcast %27 : vector<1x128xf32> to vector<16x128xf32>
    %30 = arith.mulf %28, %29 : vector<16x128xf32>
    %31 = vector.extract_strided_slice %5 {offsets = [0, 2], sizes = [16, 1], strides = [1, 1]} : vector<16x3xf32> to vector<16x1xf32>
    %32 = vector.broadcast %31 : vector<16x1xf32> to vector<16x128xf32>
    %33 = arith.addf %30, %32 : vector<16x128xf32>
    %cst_7 = arith.constant 0.000000e+00 : f32
    %34 = vector.broadcast %cst_7 : f32 to vector<16x128xf32>
    %35 = arith.maximumf %33, %34 : vector<16x128xf32>
    %c32 = arith.constant 32 : index
    %c0_8 = arith.constant 0 : index
    %36 = vector.load %arg3[%c32, %c0_8] : memref<1264x128xf32, #tpu.memory_space<vmem>>, vector<16x128xf32>
    %37 = vector.extract_strided_slice %36 {offsets = [0, 0], sizes = [16, 32], strides = [1, 1]} : vector<16x128xf32> to vector<16x32xf32>
    %cst_9 = arith.constant dense<0.000000e+00> : vector<16x128xf32>
    %38 = tpu.matmul %37, %1, %cst_9 {dimension_numbers = #tpu.dot_dimension_numbers<[1], [0], [0], [1], [0, 0, 1, 1], [], []>} : vector<16x32xf32>, vector<32x128xf32>, vector<16x128xf32> -> vector<16x128xf32>
    %c48 = arith.constant 48 : index
    %c0_10 = arith.constant 0 : index
    %39 = vector.load %arg3[%c48, %c0_10] : memref<1264x128xf32, #tpu.memory_space<vmem>>, vector<16x128xf32>
    %40 = vector.extract_strided_slice %39 {offsets = [0, 0], sizes = [16, 1], strides = [1, 1]} : vector<16x128xf32> to vector<16x1xf32>
    %41 = vector.broadcast %40 : vector<16x1xf32> to vector<16x128xf32>
    %42 = arith.addf %38, %41 : vector<16x128xf32>
    %c64 = arith.constant 64 : index
    %c0_11 = arith.constant 0 : index
    %43 = vector.load %arg3[%c64, %c0_11] : memref<1264x128xf32, #tpu.memory_space<vmem>>, vector<48x128xf32>
    %44 = vector.extract_strided_slice %43 {offsets = [0, 0], sizes = [48, 16], strides = [1, 1]} : vector<48x128xf32> to vector<48x16xf32>
    %cst_12 = arith.constant dense<0.000000e+00> : vector<48x128xf32>
    %45 = tpu.matmul %44, %35, %cst_12 {dimension_numbers = #tpu.dot_dimension_numbers<[1], [0], [0], [1], [0, 0, 1, 1], [], []>} : vector<48x16xf32>, vector<16x128xf32>, vector<48x128xf32> -> vector<48x128xf32>
    %c112 = arith.constant 112 : index
    %c0_13 = arith.constant 0 : index
    %46 = vector.load %arg3[%c112, %c0_13] : memref<1264x128xf32, #tpu.memory_space<vmem>>, vector<48x128xf32>
    %47 = vector.extract_strided_slice %46 {offsets = [0, 0], sizes = [48, 1], strides = [1, 1]} : vector<48x128xf32> to vector<48x1xf32>
    %48 = vector.broadcast %47 : vector<48x1xf32> to vector<48x128xf32>
    %49 = arith.addf %45, %48 : vector<48x128xf32>
    %c160 = arith.constant 160 : index
    %c0_14 = arith.constant 0 : index
    %50 = vector.load %arg3[%c160, %c0_14] : memref<1264x128xf32, #tpu.memory_space<vmem>>, vector<48x128xf32>
    %51 = vector.extract_strided_slice %50 {offsets = [0, 0], sizes = [48, 16], strides = [1, 1]} : vector<48x128xf32> to vector<48x16xf32>
    %cst_15 = arith.constant dense<0.000000e+00> : vector<48x128xf32>
    %52 = tpu.matmul %51, %15, %cst_15 {dimension_numbers = #tpu.dot_dimension_numbers<[1], [0], [0], [1], [0, 0, 1, 1], [], []>} : vector<48x16xf32>, vector<16x128xf32>, vector<48x128xf32> -> vector<48x128xf32>
    %c208 = arith.constant 208 : index
    %c0_16 = arith.constant 0 : index
    %53 = vector.load %arg3[%c208, %c0_16] : memref<1264x128xf32, #tpu.memory_space<vmem>>, vector<48x128xf32>
    %54 = vector.extract_strided_slice %53 {offsets = [0, 0], sizes = [48, 1], strides = [1, 1]} : vector<48x128xf32> to vector<48x1xf32>
    %55 = vector.broadcast %54 : vector<48x1xf32> to vector<48x128xf32>
    %56 = arith.addf %52, %55 : vector<48x128xf32>
    %c256 = arith.constant 256 : index
    %c0_17 = arith.constant 0 : index
    %57 = vector.load %arg3[%c256, %c0_17] : memref<1264x128xf32, #tpu.memory_space<vmem>>, vector<16x128xf32>
    %58 = vector.extract_strided_slice %57 {offsets = [0, 0], sizes = [16, 16], strides = [1, 1]} : vector<16x128xf32> to vector<16x16xf32>
    %cst_18 = arith.constant dense<0.000000e+00> : vector<16x128xf32>
    %59 = tpu.matmul %58, %25, %cst_18 {dimension_numbers = #tpu.dot_dimension_numbers<[1], [0], [0], [1], [0, 0, 1, 1], [], []>} : vector<16x16xf32>, vector<16x128xf32>, vector<16x128xf32> -> vector<16x128xf32>
    %c272 = arith.constant 272 : index
    %c0_19 = arith.constant 0 : index
    %60 = vector.load %arg3[%c272, %c0_19] : memref<1264x128xf32, #tpu.memory_space<vmem>>, vector<16x128xf32>
    %61 = vector.extract_strided_slice %60 {offsets = [0, 0], sizes = [16, 1], strides = [1, 1]} : vector<16x128xf32> to vector<16x1xf32>
    %62 = vector.broadcast %61 : vector<16x1xf32> to vector<16x128xf32>
    %63 = arith.addf %59, %62 : vector<16x128xf32>
    %c288 = arith.constant 288 : index
    %c0_20 = arith.constant 0 : index
    %64 = vector.load %arg3[%c288, %c0_20] : memref<1264x128xf32, #tpu.memory_space<vmem>>, vector<112x128xf32>
    %65 = vector.extract_strided_slice %64 {offsets = [0, 0], sizes = [112, 16], strides = [1, 1]} : vector<112x128xf32> to vector<112x16xf32>
    %cst_21 = arith.constant dense<0.000000e+00> : vector<112x128xf32>
    %66 = tpu.matmul %65, %42, %cst_21 {dimension_numbers = #tpu.dot_dimension_numbers<[1], [0], [0], [1], [0, 0, 1, 1], [], []>} : vector<112x16xf32>, vector<16x128xf32>, vector<112x128xf32> -> vector<112x128xf32>
    %c400 = arith.constant 400 : index
    %c0_22 = arith.constant 0 : index
    %67 = vector.load %arg3[%c400, %c0_22] : memref<1264x128xf32, #tpu.memory_space<vmem>>, vector<112x128xf32>
    %68 = vector.extract_strided_slice %67 {offsets = [0, 0], sizes = [112, 1], strides = [1, 1]} : vector<112x128xf32> to vector<112x1xf32>
    %69 = vector.broadcast %68 : vector<112x1xf32> to vector<112x128xf32>
    %70 = arith.addf %66, %69 : vector<112x128xf32>
    %c512 = arith.constant 512 : index
    %c0_23 = arith.constant 0 : index
    %71 = vector.load %arg3[%c512, %c0_23] : memref<1264x128xf32, #tpu.memory_space<vmem>>, vector<48x128xf32>
    %72 = vector.extract_strided_slice %71 {offsets = [0, 0], sizes = [48, 48], strides = [1, 1]} : vector<48x128xf32> to vector<48x48xf32>
    %cst_24 = arith.constant dense<0.000000e+00> : vector<48x128xf32>
    %73 = tpu.matmul %72, %49, %cst_24 {dimension_numbers = #tpu.dot_dimension_numbers<[1], [0], [0], [1], [0, 0, 1, 1], [], []>} : vector<48x48xf32>, vector<48x128xf32>, vector<48x128xf32> -> vector<48x128xf32>
    %c560 = arith.constant 560 : index
    %c0_25 = arith.constant 0 : index
    %74 = vector.load %arg3[%c560, %c0_25] : memref<1264x128xf32, #tpu.memory_space<vmem>>, vector<48x128xf32>
    %75 = vector.extract_strided_slice %74 {offsets = [0, 0], sizes = [48, 1], strides = [1, 1]} : vector<48x128xf32> to vector<48x1xf32>
    %76 = vector.broadcast %75 : vector<48x1xf32> to vector<48x128xf32>
    %77 = arith.addf %73, %76 : vector<48x128xf32>
    %c512_26 = arith.constant 512 : index
    %c0_27 = arith.constant 0 : index
    %78 = vector.load %arg3[%c512_26, %c0_27] : memref<1264x128xf32, #tpu.memory_space<vmem>>, vector<48x128xf32>
    %79 = vector.extract_strided_slice %78 {offsets = [0, 0], sizes = [48, 48], strides = [1, 1]} : vector<48x128xf32> to vector<48x48xf32>
    %cst_28 = arith.constant dense<0.000000e+00> : vector<48x128xf32>
    %80 = tpu.matmul %79, %56, %cst_28 {dimension_numbers = #tpu.dot_dimension_numbers<[1], [0], [0], [1], [0, 0, 1, 1], [], []>} : vector<48x48xf32>, vector<48x128xf32>, vector<48x128xf32> -> vector<48x128xf32>
    %c560_29 = arith.constant 560 : index
    %c0_30 = arith.constant 0 : index
    %81 = vector.load %arg3[%c560_29, %c0_30] : memref<1264x128xf32, #tpu.memory_space<vmem>>, vector<48x128xf32>
    %82 = vector.extract_strided_slice %81 {offsets = [0, 0], sizes = [48, 1], strides = [1, 1]} : vector<48x128xf32> to vector<48x1xf32>
    %83 = vector.broadcast %82 : vector<48x1xf32> to vector<48x128xf32>
    %84 = arith.addf %80, %83 : vector<48x128xf32>
    %c608 = arith.constant 608 : index
    %c0_31 = arith.constant 0 : index
    %85 = vector.load %arg3[%c608, %c0_31] : memref<1264x128xf32, #tpu.memory_space<vmem>>, vector<112x128xf32>
    %86 = vector.extract_strided_slice %85 {offsets = [0, 0], sizes = [112, 112], strides = [1, 1]} : vector<112x128xf32> to vector<112x112xf32>
    %cst_32 = arith.constant dense<0.000000e+00> : vector<112x128xf32>
    %87 = tpu.matmul %86, %70, %cst_32 {dimension_numbers = #tpu.dot_dimension_numbers<[1], [0], [0], [1], [0, 0, 1, 1], [], []>} : vector<112x112xf32>, vector<112x128xf32>, vector<112x128xf32> -> vector<112x128xf32>
    %c720 = arith.constant 720 : index
    %c0_33 = arith.constant 0 : index
    %88 = vector.load %arg3[%c720, %c0_33] : memref<1264x128xf32, #tpu.memory_space<vmem>>, vector<112x128xf32>
    %89 = vector.extract_strided_slice %88 {offsets = [0, 0], sizes = [112, 1], strides = [1, 1]} : vector<112x128xf32> to vector<112x1xf32>
    %90 = vector.broadcast %89 : vector<112x1xf32> to vector<112x128xf32>
    %91 = arith.addf %87, %90 : vector<112x128xf32>
    %c832 = arith.constant 832 : index
    %c0_34 = arith.constant 0 : index
    %92 = vector.load %arg3[%c832, %c0_34] : memref<1264x128xf32, #tpu.memory_space<vmem>>, vector<16x128xf32>
    %93 = vector.extract_strided_slice %92 {offsets = [0, 0], sizes = [16, 16], strides = [1, 1]} : vector<16x128xf32> to vector<16x16xf32>
    %cst_35 = arith.constant dense<0.000000e+00> : vector<16x128xf32>
    %94 = tpu.matmul %93, %63, %cst_35 {dimension_numbers = #tpu.dot_dimension_numbers<[1], [0], [0], [1], [0, 0, 1, 1], [], []>} : vector<16x16xf32>, vector<16x128xf32>, vector<16x128xf32> -> vector<16x128xf32>
    %c848 = arith.constant 848 : index
    %c0_36 = arith.constant 0 : index
    %95 = vector.load %arg3[%c848, %c0_36] : memref<1264x128xf32, #tpu.memory_space<vmem>>, vector<16x128xf32>
    %96 = vector.extract_strided_slice %95 {offsets = [0, 0], sizes = [16, 1], strides = [1, 1]} : vector<16x128xf32> to vector<16x1xf32>
    %97 = vector.broadcast %96 : vector<16x1xf32> to vector<16x128xf32>
    %98 = arith.addf %94, %97 : vector<16x128xf32>
    %c928 = arith.constant 928 : index
    %c0_37 = arith.constant 0 : index
    %99 = vector.load %arg3[%c928, %c0_37] : memref<1264x128xf32, #tpu.memory_space<vmem>>, vector<16x128xf32>
    %100 = vector.extract_strided_slice %99 {offsets = [0, 0], sizes = [16, 16], strides = [1, 1]} : vector<16x128xf32> to vector<16x16xf32>
    %c944 = arith.constant 944 : index
    %c0_38 = arith.constant 0 : index
    %101 = vector.load %arg3[%c944, %c0_38] : memref<1264x128xf32, #tpu.memory_space<vmem>>, vector<16x128xf32>
    %102 = vector.extract_strided_slice %101 {offsets = [0, 0], sizes = [16, 1], strides = [1, 1]} : vector<16x128xf32> to vector<16x1xf32>
    %103 = vector.extract_strided_slice %77 {offsets = [0, 0], sizes = [16, 128], strides = [1, 1]} : vector<48x128xf32> to vector<16x128xf32>
    %104 = vector.extract_strided_slice %91 {offsets = [0, 0], sizes = [16, 128], strides = [1, 1]} : vector<112x128xf32> to vector<16x128xf32>
    %105 = vector.extract_strided_slice %77 {offsets = [16, 0], sizes = [16, 128], strides = [1, 1]} : vector<48x128xf32> to vector<16x128xf32>
    %106 = vector.extract_strided_slice %91 {offsets = [16, 0], sizes = [16, 128], strides = [1, 1]} : vector<112x128xf32> to vector<16x128xf32>
    %107 = vector.extract_strided_slice %77 {offsets = [32, 0], sizes = [16, 128], strides = [1, 1]} : vector<48x128xf32> to vector<16x128xf32>
    %108 = vector.extract_strided_slice %91 {offsets = [32, 0], sizes = [16, 128], strides = [1, 1]} : vector<112x128xf32> to vector<16x128xf32>
    %109 = vector.extract_strided_slice %84 {offsets = [0, 0], sizes = [16, 128], strides = [1, 1]} : vector<48x128xf32> to vector<16x128xf32>
    %110 = vector.extract_strided_slice %91 {offsets = [48, 0], sizes = [16, 128], strides = [1, 1]} : vector<112x128xf32> to vector<16x128xf32>
    %111 = vector.extract_strided_slice %84 {offsets = [16, 0], sizes = [16, 128], strides = [1, 1]} : vector<48x128xf32> to vector<16x128xf32>
    %112 = vector.extract_strided_slice %91 {offsets = [64, 0], sizes = [16, 128], strides = [1, 1]} : vector<112x128xf32> to vector<16x128xf32>
    %113 = vector.extract_strided_slice %84 {offsets = [32, 0], sizes = [16, 128], strides = [1, 1]} : vector<48x128xf32> to vector<16x128xf32>
    %114 = vector.extract_strided_slice %91 {offsets = [80, 0], sizes = [16, 128], strides = [1, 1]} : vector<112x128xf32> to vector<16x128xf32>
    %115 = vector.extract_strided_slice %91 {offsets = [96, 0], sizes = [16, 128], strides = [1, 1]} : vector<112x128xf32> to vector<16x128xf32>
    %116 = vector.extract_strided_slice %103 {offsets = [0, 0], sizes = [8, 128], strides = [1, 1]} : vector<16x128xf32> to vector<8x128xf32>
    %117 = vector.extract_strided_slice %111 {offsets = [0, 0], sizes = [8, 128], strides = [1, 1]} : vector<16x128xf32> to vector<8x128xf32>
    %118 = arith.mulf %116, %117 : vector<8x128xf32>
    %cst_39 = arith.constant dense<0.000000e+00> : vector<128xf32>
    %119 = vector.multi_reduction <add>, %118, %cst_39 [0] : vector<8x128xf32> to vector<128xf32>
    %120 = vector.shape_cast %119 : vector<128xf32> to vector<1x128xf32>
    %cst_40 = arith.constant 0.353553385 : f32
    %121 = vector.broadcast %cst_40 : f32 to vector<1x128xf32>
    %122 = arith.mulf %120, %121 : vector<1x128xf32>
    %123 = vector.extract_strided_slice %112 {offsets = [0, 0], sizes = [8, 128], strides = [1, 1]} : vector<16x128xf32> to vector<8x128xf32>
    %124 = arith.mulf %116, %123 : vector<8x128xf32>
    %cst_41 = arith.constant dense<0.000000e+00> : vector<128xf32>
    %125 = vector.multi_reduction <add>, %124, %cst_41 [0] : vector<8x128xf32> to vector<128xf32>
    %126 = vector.shape_cast %125 : vector<128xf32> to vector<1x128xf32>
    %cst_42 = arith.constant 0.353553385 : f32
    %127 = vector.broadcast %cst_42 : f32 to vector<1x128xf32>
    %128 = arith.mulf %126, %127 : vector<1x128xf32>
    %129 = arith.maximumf %122, %128 : vector<1x128xf32>
    %130 = arith.subf %122, %129 : vector<1x128xf32>
    %131 = math.exp %130 : vector<1x128xf32>
    %132 = arith.subf %128, %129 : vector<1x128xf32>
    %133 = math.exp %132 : vector<1x128xf32>
    %134 = arith.addf %131, %133 : vector<1x128xf32>
    %135 = tpu.reciprocal %134 {approx = true} : vector<1x128xf32> -> vector<1x128xf32>
    %136 = arith.mulf %131, %135 : vector<1x128xf32>
    %137 = vector.extract_strided_slice %113 {offsets = [0, 0], sizes = [8, 128], strides = [1, 1]} : vector<16x128xf32> to vector<8x128xf32>
    %138 = vector.broadcast %136 : vector<1x128xf32> to vector<8x128xf32>
    %139 = arith.mulf %138, %137 : vector<8x128xf32>
    %140 = arith.mulf %133, %135 : vector<1x128xf32>
    %141 = vector.extract_strided_slice %114 {offsets = [0, 0], sizes = [8, 128], strides = [1, 1]} : vector<16x128xf32> to vector<8x128xf32>
    %142 = vector.broadcast %140 : vector<1x128xf32> to vector<8x128xf32>
    %143 = arith.mulf %142, %141 : vector<8x128xf32>
    %144 = arith.addf %139, %143 : vector<8x128xf32>
    %145 = vector.extract_strided_slice %103 {offsets = [8, 0], sizes = [8, 128], strides = [1, 1]} : vector<16x128xf32> to vector<8x128xf32>
    %146 = vector.extract_strided_slice %111 {offsets = [8, 0], sizes = [8, 128], strides = [1, 1]} : vector<16x128xf32> to vector<8x128xf32>
    %147 = arith.mulf %145, %146 : vector<8x128xf32>
    %cst_43 = arith.constant dense<0.000000e+00> : vector<128xf32>
    %148 = vector.multi_reduction <add>, %147, %cst_43 [0] : vector<8x128xf32> to vector<128xf32>
    %149 = vector.shape_cast %148 : vector<128xf32> to vector<1x128xf32>
    %cst_44 = arith.constant 0.353553385 : f32
    %150 = vector.broadcast %cst_44 : f32 to vector<1x128xf32>
    %151 = arith.mulf %149, %150 : vector<1x128xf32>
    %152 = vector.extract_strided_slice %112 {offsets = [8, 0], sizes = [8, 128], strides = [1, 1]} : vector<16x128xf32> to vector<8x128xf32>
    %153 = arith.mulf %145, %152 : vector<8x128xf32>
    %cst_45 = arith.constant dense<0.000000e+00> : vector<128xf32>
    %154 = vector.multi_reduction <add>, %153, %cst_45 [0] : vector<8x128xf32> to vector<128xf32>
    %155 = vector.shape_cast %154 : vector<128xf32> to vector<1x128xf32>
    %cst_46 = arith.constant 0.353553385 : f32
    %156 = vector.broadcast %cst_46 : f32 to vector<1x128xf32>
    %157 = arith.mulf %155, %156 : vector<1x128xf32>
    %158 = arith.maximumf %151, %157 : vector<1x128xf32>
    %159 = arith.subf %151, %158 : vector<1x128xf32>
    %160 = math.exp %159 : vector<1x128xf32>
    %161 = arith.subf %157, %158 : vector<1x128xf32>
    %162 = math.exp %161 : vector<1x128xf32>
    %163 = arith.addf %160, %162 : vector<1x128xf32>
    %164 = tpu.reciprocal %163 {approx = true} : vector<1x128xf32> -> vector<1x128xf32>
    %165 = arith.mulf %160, %164 : vector<1x128xf32>
    %166 = vector.extract_strided_slice %113 {offsets = [8, 0], sizes = [8, 128], strides = [1, 1]} : vector<16x128xf32> to vector<8x128xf32>
    %167 = vector.broadcast %165 : vector<1x128xf32> to vector<8x128xf32>
    %168 = arith.mulf %167, %166 : vector<8x128xf32>
    %169 = arith.mulf %162, %164 : vector<1x128xf32>
    %170 = vector.extract_strided_slice %114 {offsets = [8, 0], sizes = [8, 128], strides = [1, 1]} : vector<16x128xf32> to vector<8x128xf32>
    %171 = vector.broadcast %169 : vector<1x128xf32> to vector<8x128xf32>
    %172 = arith.mulf %171, %170 : vector<8x128xf32>
    %173 = arith.addf %168, %172 : vector<8x128xf32>
    %174 = tpu.concatenate %144, %173 in 0 : vector<8x128xf32>, vector<8x128xf32> -> vector<16x128xf32>
    %cst_47 = arith.constant dense<0.000000e+00> : vector<16x128xf32>
    %175 = tpu.matmul %100, %174, %cst_47 {dimension_numbers = #tpu.dot_dimension_numbers<[1], [0], [0], [1], [0, 0, 1, 1], [], []>} : vector<16x16xf32>, vector<16x128xf32>, vector<16x128xf32> -> vector<16x128xf32>
    %176 = vector.broadcast %102 : vector<16x1xf32> to vector<16x128xf32>
    %177 = arith.addf %175, %176 : vector<16x128xf32>
    %178 = vector.extract_strided_slice %104 {offsets = [0, 0], sizes = [8, 128], strides = [1, 1]} : vector<16x128xf32> to vector<8x128xf32>
    %179 = vector.extract_strided_slice %111 {offsets = [0, 0], sizes = [8, 128], strides = [1, 1]} : vector<16x128xf32> to vector<8x128xf32>
    %180 = arith.mulf %178, %179 : vector<8x128xf32>
    %cst_48 = arith.constant dense<0.000000e+00> : vector<128xf32>
    %181 = vector.multi_reduction <add>, %180, %cst_48 [0] : vector<8x128xf32> to vector<128xf32>
    %182 = vector.shape_cast %181 : vector<128xf32> to vector<1x128xf32>
    %cst_49 = arith.constant 0.353553385 : f32
    %183 = vector.broadcast %cst_49 : f32 to vector<1x128xf32>
    %184 = arith.mulf %182, %183 : vector<1x128xf32>
    %185 = vector.extract_strided_slice %112 {offsets = [0, 0], sizes = [8, 128], strides = [1, 1]} : vector<16x128xf32> to vector<8x128xf32>
    %186 = arith.mulf %178, %185 : vector<8x128xf32>
    %cst_50 = arith.constant dense<0.000000e+00> : vector<128xf32>
    %187 = vector.multi_reduction <add>, %186, %cst_50 [0] : vector<8x128xf32> to vector<128xf32>
    %188 = vector.shape_cast %187 : vector<128xf32> to vector<1x128xf32>
    %cst_51 = arith.constant 0.353553385 : f32
    %189 = vector.broadcast %cst_51 : f32 to vector<1x128xf32>
    %190 = arith.mulf %188, %189 : vector<1x128xf32>
    %191 = arith.maximumf %184, %190 : vector<1x128xf32>
    %192 = arith.subf %184, %191 : vector<1x128xf32>
    %193 = math.exp %192 : vector<1x128xf32>
    %194 = arith.subf %190, %191 : vector<1x128xf32>
    %195 = math.exp %194 : vector<1x128xf32>
    %196 = arith.addf %193, %195 : vector<1x128xf32>
    %197 = tpu.reciprocal %196 {approx = true} : vector<1x128xf32> -> vector<1x128xf32>
    %198 = arith.mulf %193, %197 : vector<1x128xf32>
    %199 = vector.extract_strided_slice %113 {offsets = [0, 0], sizes = [8, 128], strides = [1, 1]} : vector<16x128xf32> to vector<8x128xf32>
    %200 = vector.broadcast %198 : vector<1x128xf32> to vector<8x128xf32>
    %201 = arith.mulf %200, %199 : vector<8x128xf32>
    %202 = arith.mulf %195, %197 : vector<1x128xf32>
    %203 = vector.extract_strided_slice %114 {offsets = [0, 0], sizes = [8, 128], strides = [1, 1]} : vector<16x128xf32> to vector<8x128xf32>
    %204 = vector.broadcast %202 : vector<1x128xf32> to vector<8x128xf32>
    %205 = arith.mulf %204, %203 : vector<8x128xf32>
    %206 = arith.addf %201, %205 : vector<8x128xf32>
    %207 = vector.extract_strided_slice %104 {offsets = [8, 0], sizes = [8, 128], strides = [1, 1]} : vector<16x128xf32> to vector<8x128xf32>
    %208 = vector.extract_strided_slice %111 {offsets = [8, 0], sizes = [8, 128], strides = [1, 1]} : vector<16x128xf32> to vector<8x128xf32>
    %209 = arith.mulf %207, %208 : vector<8x128xf32>
    %cst_52 = arith.constant dense<0.000000e+00> : vector<128xf32>
    %210 = vector.multi_reduction <add>, %209, %cst_52 [0] : vector<8x128xf32> to vector<128xf32>
    %211 = vector.shape_cast %210 : vector<128xf32> to vector<1x128xf32>
    %cst_53 = arith.constant 0.353553385 : f32
    %212 = vector.broadcast %cst_53 : f32 to vector<1x128xf32>
    %213 = arith.mulf %211, %212 : vector<1x128xf32>
    %214 = vector.extract_strided_slice %112 {offsets = [8, 0], sizes = [8, 128], strides = [1, 1]} : vector<16x128xf32> to vector<8x128xf32>
    %215 = arith.mulf %207, %214 : vector<8x128xf32>
    %cst_54 = arith.constant dense<0.000000e+00> : vector<128xf32>
    %216 = vector.multi_reduction <add>, %215, %cst_54 [0] : vector<8x128xf32> to vector<128xf32>
    %217 = vector.shape_cast %216 : vector<128xf32> to vector<1x128xf32>
    %cst_55 = arith.constant 0.353553385 : f32
    %218 = vector.broadcast %cst_55 : f32 to vector<1x128xf32>
    %219 = arith.mulf %217, %218 : vector<1x128xf32>
    %220 = arith.maximumf %213, %219 : vector<1x128xf32>
    %221 = arith.subf %213, %220 : vector<1x128xf32>
    %222 = math.exp %221 : vector<1x128xf32>
    %223 = arith.subf %219, %220 : vector<1x128xf32>
    %224 = math.exp %223 : vector<1x128xf32>
    %225 = arith.addf %222, %224 : vector<1x128xf32>
    %226 = tpu.reciprocal %225 {approx = true} : vector<1x128xf32> -> vector<1x128xf32>
    %227 = arith.mulf %222, %226 : vector<1x128xf32>
    %228 = vector.extract_strided_slice %113 {offsets = [8, 0], sizes = [8, 128], strides = [1, 1]} : vector<16x128xf32> to vector<8x128xf32>
    %229 = vector.broadcast %227 : vector<1x128xf32> to vector<8x128xf32>
    %230 = arith.mulf %229, %228 : vector<8x128xf32>
    %231 = arith.mulf %224, %226 : vector<1x128xf32>
    %232 = vector.extract_strided_slice %114 {offsets = [8, 0], sizes = [8, 128], strides = [1, 1]} : vector<16x128xf32> to vector<8x128xf32>
    %233 = vector.broadcast %231 : vector<1x128xf32> to vector<8x128xf32>
    %234 = arith.mulf %233, %232 : vector<8x128xf32>
    %235 = arith.addf %230, %234 : vector<8x128xf32>
    %236 = tpu.concatenate %206, %235 in 0 : vector<8x128xf32>, vector<8x128xf32> -> vector<16x128xf32>
    %cst_56 = arith.constant dense<0.000000e+00> : vector<16x128xf32>
    %237 = tpu.matmul %100, %236, %cst_56 {dimension_numbers = #tpu.dot_dimension_numbers<[1], [0], [0], [1], [0, 0, 1, 1], [], []>} : vector<16x16xf32>, vector<16x128xf32>, vector<16x128xf32> -> vector<16x128xf32>
    %238 = vector.broadcast %102 : vector<16x1xf32> to vector<16x128xf32>
    %239 = arith.addf %237, %238 : vector<16x128xf32>
    %240 = vector.extract_strided_slice %109 {offsets = [0, 0], sizes = [8, 128], strides = [1, 1]} : vector<16x128xf32> to vector<8x128xf32>
    %241 = vector.extract_strided_slice %105 {offsets = [0, 0], sizes = [8, 128], strides = [1, 1]} : vector<16x128xf32> to vector<8x128xf32>
    %242 = arith.mulf %240, %241 : vector<8x128xf32>
    %cst_57 = arith.constant dense<0.000000e+00> : vector<128xf32>
    %243 = vector.multi_reduction <add>, %242, %cst_57 [0] : vector<8x128xf32> to vector<128xf32>
    %244 = vector.shape_cast %243 : vector<128xf32> to vector<1x128xf32>
    %cst_58 = arith.constant 0.353553385 : f32
    %245 = vector.broadcast %cst_58 : f32 to vector<1x128xf32>
    %246 = arith.mulf %244, %245 : vector<1x128xf32>
    %247 = vector.extract_strided_slice %106 {offsets = [0, 0], sizes = [8, 128], strides = [1, 1]} : vector<16x128xf32> to vector<8x128xf32>
    %248 = arith.mulf %240, %247 : vector<8x128xf32>
    %cst_59 = arith.constant dense<0.000000e+00> : vector<128xf32>
    %249 = vector.multi_reduction <add>, %248, %cst_59 [0] : vector<8x128xf32> to vector<128xf32>
    %250 = vector.shape_cast %249 : vector<128xf32> to vector<1x128xf32>
    %cst_60 = arith.constant 0.353553385 : f32
    %251 = vector.broadcast %cst_60 : f32 to vector<1x128xf32>
    %252 = arith.mulf %250, %251 : vector<1x128xf32>
    %253 = arith.maximumf %246, %252 : vector<1x128xf32>
    %254 = arith.subf %246, %253 : vector<1x128xf32>
    %255 = math.exp %254 : vector<1x128xf32>
    %256 = arith.subf %252, %253 : vector<1x128xf32>
    %257 = math.exp %256 : vector<1x128xf32>
    %258 = arith.addf %255, %257 : vector<1x128xf32>
    %259 = tpu.reciprocal %258 {approx = true} : vector<1x128xf32> -> vector<1x128xf32>
    %260 = arith.mulf %255, %259 : vector<1x128xf32>
    %261 = vector.extract_strided_slice %107 {offsets = [0, 0], sizes = [8, 128], strides = [1, 1]} : vector<16x128xf32> to vector<8x128xf32>
    %262 = vector.broadcast %260 : vector<1x128xf32> to vector<8x128xf32>
    %263 = arith.mulf %262, %261 : vector<8x128xf32>
    %264 = arith.mulf %257, %259 : vector<1x128xf32>
    %265 = vector.extract_strided_slice %108 {offsets = [0, 0], sizes = [8, 128], strides = [1, 1]} : vector<16x128xf32> to vector<8x128xf32>
    %266 = vector.broadcast %264 : vector<1x128xf32> to vector<8x128xf32>
    %267 = arith.mulf %266, %265 : vector<8x128xf32>
    %268 = arith.addf %263, %267 : vector<8x128xf32>
    %269 = vector.extract_strided_slice %109 {offsets = [8, 0], sizes = [8, 128], strides = [1, 1]} : vector<16x128xf32> to vector<8x128xf32>
    %270 = vector.extract_strided_slice %105 {offsets = [8, 0], sizes = [8, 128], strides = [1, 1]} : vector<16x128xf32> to vector<8x128xf32>
    %271 = arith.mulf %269, %270 : vector<8x128xf32>
    %cst_61 = arith.constant dense<0.000000e+00> : vector<128xf32>
    %272 = vector.multi_reduction <add>, %271, %cst_61 [0] : vector<8x128xf32> to vector<128xf32>
    %273 = vector.shape_cast %272 : vector<128xf32> to vector<1x128xf32>
    %cst_62 = arith.constant 0.353553385 : f32
    %274 = vector.broadcast %cst_62 : f32 to vector<1x128xf32>
    %275 = arith.mulf %273, %274 : vector<1x128xf32>
    %276 = vector.extract_strided_slice %106 {offsets = [8, 0], sizes = [8, 128], strides = [1, 1]} : vector<16x128xf32> to vector<8x128xf32>
    %277 = arith.mulf %269, %276 : vector<8x128xf32>
    %cst_63 = arith.constant dense<0.000000e+00> : vector<128xf32>
    %278 = vector.multi_reduction <add>, %277, %cst_63 [0] : vector<8x128xf32> to vector<128xf32>
    %279 = vector.shape_cast %278 : vector<128xf32> to vector<1x128xf32>
    %cst_64 = arith.constant 0.353553385 : f32
    %280 = vector.broadcast %cst_64 : f32 to vector<1x128xf32>
    %281 = arith.mulf %279, %280 : vector<1x128xf32>
    %282 = arith.maximumf %275, %281 : vector<1x128xf32>
    %283 = arith.subf %275, %282 : vector<1x128xf32>
    %284 = math.exp %283 : vector<1x128xf32>
    %285 = arith.subf %281, %282 : vector<1x128xf32>
    %286 = math.exp %285 : vector<1x128xf32>
    %287 = arith.addf %284, %286 : vector<1x128xf32>
    %288 = tpu.reciprocal %287 {approx = true} : vector<1x128xf32> -> vector<1x128xf32>
    %289 = arith.mulf %284, %288 : vector<1x128xf32>
    %290 = vector.extract_strided_slice %107 {offsets = [8, 0], sizes = [8, 128], strides = [1, 1]} : vector<16x128xf32> to vector<8x128xf32>
    %291 = vector.broadcast %289 : vector<1x128xf32> to vector<8x128xf32>
    %292 = arith.mulf %291, %290 : vector<8x128xf32>
    %293 = arith.mulf %286, %288 : vector<1x128xf32>
    %294 = vector.extract_strided_slice %108 {offsets = [8, 0], sizes = [8, 128], strides = [1, 1]} : vector<16x128xf32> to vector<8x128xf32>
    %295 = vector.broadcast %293 : vector<1x128xf32> to vector<8x128xf32>
    %296 = arith.mulf %295, %294 : vector<8x128xf32>
    %297 = arith.addf %292, %296 : vector<8x128xf32>
    %298 = tpu.concatenate %268, %297 in 0 : vector<8x128xf32>, vector<8x128xf32> -> vector<16x128xf32>
    %cst_65 = arith.constant dense<0.000000e+00> : vector<16x128xf32>
    %299 = tpu.matmul %100, %298, %cst_65 {dimension_numbers = #tpu.dot_dimension_numbers<[1], [0], [0], [1], [0, 0, 1, 1], [], []>} : vector<16x16xf32>, vector<16x128xf32>, vector<16x128xf32> -> vector<16x128xf32>
    %300 = vector.broadcast %102 : vector<16x1xf32> to vector<16x128xf32>
    %301 = arith.addf %299, %300 : vector<16x128xf32>
    %302 = vector.extract_strided_slice %110 {offsets = [0, 0], sizes = [8, 128], strides = [1, 1]} : vector<16x128xf32> to vector<8x128xf32>
    %303 = vector.extract_strided_slice %105 {offsets = [0, 0], sizes = [8, 128], strides = [1, 1]} : vector<16x128xf32> to vector<8x128xf32>
    %304 = arith.mulf %302, %303 : vector<8x128xf32>
    %cst_66 = arith.constant dense<0.000000e+00> : vector<128xf32>
    %305 = vector.multi_reduction <add>, %304, %cst_66 [0] : vector<8x128xf32> to vector<128xf32>
    %306 = vector.shape_cast %305 : vector<128xf32> to vector<1x128xf32>
    %cst_67 = arith.constant 0.353553385 : f32
    %307 = vector.broadcast %cst_67 : f32 to vector<1x128xf32>
    %308 = arith.mulf %306, %307 : vector<1x128xf32>
    %309 = vector.extract_strided_slice %106 {offsets = [0, 0], sizes = [8, 128], strides = [1, 1]} : vector<16x128xf32> to vector<8x128xf32>
    %310 = arith.mulf %302, %309 : vector<8x128xf32>
    %cst_68 = arith.constant dense<0.000000e+00> : vector<128xf32>
    %311 = vector.multi_reduction <add>, %310, %cst_68 [0] : vector<8x128xf32> to vector<128xf32>
    %312 = vector.shape_cast %311 : vector<128xf32> to vector<1x128xf32>
    %cst_69 = arith.constant 0.353553385 : f32
    %313 = vector.broadcast %cst_69 : f32 to vector<1x128xf32>
    %314 = arith.mulf %312, %313 : vector<1x128xf32>
    %315 = arith.maximumf %308, %314 : vector<1x128xf32>
    %316 = arith.subf %308, %315 : vector<1x128xf32>
    %317 = math.exp %316 : vector<1x128xf32>
    %318 = arith.subf %314, %315 : vector<1x128xf32>
    %319 = math.exp %318 : vector<1x128xf32>
    %320 = arith.addf %317, %319 : vector<1x128xf32>
    %321 = tpu.reciprocal %320 {approx = true} : vector<1x128xf32> -> vector<1x128xf32>
    %322 = arith.mulf %317, %321 : vector<1x128xf32>
    %323 = vector.extract_strided_slice %107 {offsets = [0, 0], sizes = [8, 128], strides = [1, 1]} : vector<16x128xf32> to vector<8x128xf32>
    %324 = vector.broadcast %322 : vector<1x128xf32> to vector<8x128xf32>
    %325 = arith.mulf %324, %323 : vector<8x128xf32>
    %326 = arith.mulf %319, %321 : vector<1x128xf32>
    %327 = vector.extract_strided_slice %108 {offsets = [0, 0], sizes = [8, 128], strides = [1, 1]} : vector<16x128xf32> to vector<8x128xf32>
    %328 = vector.broadcast %326 : vector<1x128xf32> to vector<8x128xf32>
    %329 = arith.mulf %328, %327 : vector<8x128xf32>
    %330 = arith.addf %325, %329 : vector<8x128xf32>
    %331 = vector.extract_strided_slice %110 {offsets = [8, 0], sizes = [8, 128], strides = [1, 1]} : vector<16x128xf32> to vector<8x128xf32>
    %332 = vector.extract_strided_slice %105 {offsets = [8, 0], sizes = [8, 128], strides = [1, 1]} : vector<16x128xf32> to vector<8x128xf32>
    %333 = arith.mulf %331, %332 : vector<8x128xf32>
    %cst_70 = arith.constant dense<0.000000e+00> : vector<128xf32>
    %334 = vector.multi_reduction <add>, %333, %cst_70 [0] : vector<8x128xf32> to vector<128xf32>
    %335 = vector.shape_cast %334 : vector<128xf32> to vector<1x128xf32>
    %cst_71 = arith.constant 0.353553385 : f32
    %336 = vector.broadcast %cst_71 : f32 to vector<1x128xf32>
    %337 = arith.mulf %335, %336 : vector<1x128xf32>
    %338 = vector.extract_strided_slice %106 {offsets = [8, 0], sizes = [8, 128], strides = [1, 1]} : vector<16x128xf32> to vector<8x128xf32>
    %339 = arith.mulf %331, %338 : vector<8x128xf32>
    %cst_72 = arith.constant dense<0.000000e+00> : vector<128xf32>
    %340 = vector.multi_reduction <add>, %339, %cst_72 [0] : vector<8x128xf32> to vector<128xf32>
    %341 = vector.shape_cast %340 : vector<128xf32> to vector<1x128xf32>
    %cst_73 = arith.constant 0.353553385 : f32
    %342 = vector.broadcast %cst_73 : f32 to vector<1x128xf32>
    %343 = arith.mulf %341, %342 : vector<1x128xf32>
    %344 = arith.maximumf %337, %343 : vector<1x128xf32>
    %345 = arith.subf %337, %344 : vector<1x128xf32>
    %346 = math.exp %345 : vector<1x128xf32>
    %347 = arith.subf %343, %344 : vector<1x128xf32>
    %348 = math.exp %347 : vector<1x128xf32>
    %349 = arith.addf %346, %348 : vector<1x128xf32>
    %350 = tpu.reciprocal %349 {approx = true} : vector<1x128xf32> -> vector<1x128xf32>
    %351 = arith.mulf %346, %350 : vector<1x128xf32>
    %352 = vector.extract_strided_slice %107 {offsets = [8, 0], sizes = [8, 128], strides = [1, 1]} : vector<16x128xf32> to vector<8x128xf32>
    %353 = vector.broadcast %351 : vector<1x128xf32> to vector<8x128xf32>
    %354 = arith.mulf %353, %352 : vector<8x128xf32>
    %355 = arith.mulf %348, %350 : vector<1x128xf32>
    %356 = vector.extract_strided_slice %108 {offsets = [8, 0], sizes = [8, 128], strides = [1, 1]} : vector<16x128xf32> to vector<8x128xf32>
    %357 = vector.broadcast %355 : vector<1x128xf32> to vector<8x128xf32>
    %358 = arith.mulf %357, %356 : vector<8x128xf32>
    %359 = arith.addf %354, %358 : vector<8x128xf32>
    %360 = tpu.concatenate %330, %359 in 0 : vector<8x128xf32>, vector<8x128xf32> -> vector<16x128xf32>
    %cst_74 = arith.constant dense<0.000000e+00> : vector<16x128xf32>
    %361 = tpu.matmul %100, %360, %cst_74 {dimension_numbers = #tpu.dot_dimension_numbers<[1], [0], [0], [1], [0, 0, 1, 1], [], []>} : vector<16x16xf32>, vector<16x128xf32>, vector<16x128xf32> -> vector<16x128xf32>
    %362 = vector.broadcast %102 : vector<16x1xf32> to vector<16x128xf32>
    %363 = arith.addf %361, %362 : vector<16x128xf32>
    %364 = tpu.concatenate %177, %239, %301, %363 in 0 : vector<16x128xf32>, vector<16x128xf32>, vector<16x128xf32>, vector<16x128xf32> -> vector<64x128xf32>
    %c960 = arith.constant 960 : index
    %c0_75 = arith.constant 0 : index
    %365 = vector.load %arg3[%c960, %c0_75] : memref<1264x128xf32, #tpu.memory_space<vmem>>, vector<16x128xf32>
    %366 = vector.extract_strided_slice %365 {offsets = [0, 0], sizes = [16, 64], strides = [1, 1]} : vector<16x128xf32> to vector<16x64xf32>
    %cst_76 = arith.constant dense<0.000000e+00> : vector<16x128xf32>
    %367 = tpu.matmul %366, %364, %cst_76 {dimension_numbers = #tpu.dot_dimension_numbers<[1], [0], [0], [1], [0, 0, 1, 1], [], []>} : vector<16x64xf32>, vector<64x128xf32>, vector<16x128xf32> -> vector<16x128xf32>
    %c976 = arith.constant 976 : index
    %c0_77 = arith.constant 0 : index
    %368 = vector.load %arg3[%c976, %c0_77] : memref<1264x128xf32, #tpu.memory_space<vmem>>, vector<16x128xf32>
    %369 = vector.extract_strided_slice %368 {offsets = [0, 0], sizes = [16, 1], strides = [1, 1]} : vector<16x128xf32> to vector<16x1xf32>
    %370 = vector.broadcast %369 : vector<16x1xf32> to vector<16x128xf32>
    %371 = arith.addf %367, %370 : vector<16x128xf32>
    %c864 = arith.constant 864 : index
    %c0_78 = arith.constant 0 : index
    %372 = vector.load %arg3[%c864, %c0_78] : memref<1264x128xf32, #tpu.memory_space<vmem>>, vector<32x128xf32>
    %373 = vector.extract_strided_slice %372 {offsets = [0, 0], sizes = [32, 16], strides = [1, 1]} : vector<32x128xf32> to vector<32x16xf32>
    %cst_79 = arith.constant dense<0.000000e+00> : vector<32x128xf32>
    %374 = tpu.matmul %373, %371, %cst_79 {dimension_numbers = #tpu.dot_dimension_numbers<[1], [0], [0], [1], [0, 0, 1, 1], [], []>} : vector<32x16xf32>, vector<16x128xf32>, vector<32x128xf32> -> vector<32x128xf32>
    %c896 = arith.constant 896 : index
    %c0_80 = arith.constant 0 : index
    %375 = vector.load %arg3[%c896, %c0_80] : memref<1264x128xf32, #tpu.memory_space<vmem>>, vector<32x128xf32>
    %376 = vector.extract_strided_slice %375 {offsets = [0, 0], sizes = [32, 1], strides = [1, 1]} : vector<32x128xf32> to vector<32x1xf32>
    %377 = vector.broadcast %376 : vector<32x1xf32> to vector<32x128xf32>
    %378 = arith.addf %374, %377 : vector<32x128xf32>
    %379 = vector.extract_strided_slice %378 {offsets = [0, 0], sizes = [16, 128], strides = [1, 1]} : vector<32x128xf32> to vector<16x128xf32>
    %380 = vector.extract_strided_slice %378 {offsets = [16, 0], sizes = [16, 128], strides = [1, 1]} : vector<32x128xf32> to vector<16x128xf32>
    %381 = vector.extract_strided_slice %98 {offsets = [0, 0], sizes = [8, 128], strides = [1, 1]} : vector<16x128xf32> to vector<8x128xf32>
    %382 = vector.extract_strided_slice %379 {offsets = [0, 0], sizes = [8, 128], strides = [1, 1]} : vector<16x128xf32> to vector<8x128xf32>
    %383 = arith.mulf %381, %382 : vector<8x128xf32>
    %cst_81 = arith.constant dense<0.000000e+00> : vector<128xf32>
    %384 = vector.multi_reduction <add>, %383, %cst_81 [0] : vector<8x128xf32> to vector<128xf32>
    %385 = vector.shape_cast %384 : vector<128xf32> to vector<1x128xf32>
    %cst_82 = arith.constant 0.353553385 : f32
    %386 = vector.broadcast %cst_82 : f32 to vector<1x128xf32>
    %387 = arith.mulf %385, %386 : vector<1x128xf32>
    %388 = arith.subf %387, %387 : vector<1x128xf32>
    %389 = math.exp %388 : vector<1x128xf32>
    %390 = tpu.reciprocal %389 {approx = true} : vector<1x128xf32> -> vector<1x128xf32>
    %391 = arith.mulf %389, %390 : vector<1x128xf32>
    %392 = vector.extract_strided_slice %380 {offsets = [0, 0], sizes = [8, 128], strides = [1, 1]} : vector<16x128xf32> to vector<8x128xf32>
    %393 = vector.broadcast %391 : vector<1x128xf32> to vector<8x128xf32>
    %394 = arith.mulf %393, %392 : vector<8x128xf32>
    %395 = vector.extract_strided_slice %98 {offsets = [8, 0], sizes = [8, 128], strides = [1, 1]} : vector<16x128xf32> to vector<8x128xf32>
    %396 = vector.extract_strided_slice %379 {offsets = [8, 0], sizes = [8, 128], strides = [1, 1]} : vector<16x128xf32> to vector<8x128xf32>
    %397 = arith.mulf %395, %396 : vector<8x128xf32>
    %cst_83 = arith.constant dense<0.000000e+00> : vector<128xf32>
    %398 = vector.multi_reduction <add>, %397, %cst_83 [0] : vector<8x128xf32> to vector<128xf32>
    %399 = vector.shape_cast %398 : vector<128xf32> to vector<1x128xf32>
    %cst_84 = arith.constant 0.353553385 : f32
    %400 = vector.broadcast %cst_84 : f32 to vector<1x128xf32>
    %401 = arith.mulf %399, %400 : vector<1x128xf32>
    %402 = arith.subf %401, %401 : vector<1x128xf32>
    %403 = math.exp %402 : vector<1x128xf32>
    %404 = tpu.reciprocal %403 {approx = true} : vector<1x128xf32> -> vector<1x128xf32>
    %405 = arith.mulf %403, %404 : vector<1x128xf32>
    %406 = vector.extract_strided_slice %380 {offsets = [8, 0], sizes = [8, 128], strides = [1, 1]} : vector<16x128xf32> to vector<8x128xf32>
    %407 = vector.broadcast %405 : vector<1x128xf32> to vector<8x128xf32>
    %408 = arith.mulf %407, %406 : vector<8x128xf32>
    %409 = tpu.concatenate %394, %408 in 0 : vector<8x128xf32>, vector<8x128xf32> -> vector<16x128xf32>
    %cst_85 = arith.constant dense<0.000000e+00> : vector<16x128xf32>
    %410 = tpu.matmul %100, %409, %cst_85 {dimension_numbers = #tpu.dot_dimension_numbers<[1], [0], [0], [1], [0, 0, 1, 1], [], []>} : vector<16x16xf32>, vector<16x128xf32>, vector<16x128xf32> -> vector<16x128xf32>
    %411 = vector.broadcast %102 : vector<16x1xf32> to vector<16x128xf32>
    %412 = arith.addf %410, %411 : vector<16x128xf32>
    %413 = vector.extract_strided_slice %115 {offsets = [0, 0], sizes = [8, 128], strides = [1, 1]} : vector<16x128xf32> to vector<8x128xf32>
    %414 = vector.extract_strided_slice %379 {offsets = [0, 0], sizes = [8, 128], strides = [1, 1]} : vector<16x128xf32> to vector<8x128xf32>
    %415 = arith.mulf %413, %414 : vector<8x128xf32>
    %cst_86 = arith.constant dense<0.000000e+00> : vector<128xf32>
    %416 = vector.multi_reduction <add>, %415, %cst_86 [0] : vector<8x128xf32> to vector<128xf32>
    %417 = vector.shape_cast %416 : vector<128xf32> to vector<1x128xf32>
    %cst_87 = arith.constant 0.353553385 : f32
    %418 = vector.broadcast %cst_87 : f32 to vector<1x128xf32>
    %419 = arith.mulf %417, %418 : vector<1x128xf32>
    %420 = arith.subf %419, %419 : vector<1x128xf32>
    %421 = math.exp %420 : vector<1x128xf32>
    %422 = tpu.reciprocal %421 {approx = true} : vector<1x128xf32> -> vector<1x128xf32>
    %423 = arith.mulf %421, %422 : vector<1x128xf32>
    %424 = vector.extract_strided_slice %380 {offsets = [0, 0], sizes = [8, 128], strides = [1, 1]} : vector<16x128xf32> to vector<8x128xf32>
    %425 = vector.broadcast %423 : vector<1x128xf32> to vector<8x128xf32>
    %426 = arith.mulf %425, %424 : vector<8x128xf32>
    %427 = vector.extract_strided_slice %115 {offsets = [8, 0], sizes = [8, 128], strides = [1, 1]} : vector<16x128xf32> to vector<8x128xf32>
    %428 = vector.extract_strided_slice %379 {offsets = [8, 0], sizes = [8, 128], strides = [1, 1]} : vector<16x128xf32> to vector<8x128xf32>
    %429 = arith.mulf %427, %428 : vector<8x128xf32>
    %cst_88 = arith.constant dense<0.000000e+00> : vector<128xf32>
    %430 = vector.multi_reduction <add>, %429, %cst_88 [0] : vector<8x128xf32> to vector<128xf32>
    %431 = vector.shape_cast %430 : vector<128xf32> to vector<1x128xf32>
    %cst_89 = arith.constant 0.353553385 : f32
    %432 = vector.broadcast %cst_89 : f32 to vector<1x128xf32>
    %433 = arith.mulf %431, %432 : vector<1x128xf32>
    %434 = arith.subf %433, %433 : vector<1x128xf32>
    %435 = math.exp %434 : vector<1x128xf32>
    %436 = tpu.reciprocal %435 {approx = true} : vector<1x128xf32> -> vector<1x128xf32>
    %437 = arith.mulf %435, %436 : vector<1x128xf32>
    %438 = vector.extract_strided_slice %380 {offsets = [8, 0], sizes = [8, 128], strides = [1, 1]} : vector<16x128xf32> to vector<8x128xf32>
    %439 = vector.broadcast %437 : vector<1x128xf32> to vector<8x128xf32>
    %440 = arith.mulf %439, %438 : vector<8x128xf32>
    %441 = tpu.concatenate %426, %440 in 0 : vector<8x128xf32>, vector<8x128xf32> -> vector<16x128xf32>
    %cst_90 = arith.constant dense<0.000000e+00> : vector<16x128xf32>
    %442 = tpu.matmul %100, %441, %cst_90 {dimension_numbers = #tpu.dot_dimension_numbers<[1], [0], [0], [1], [0, 0, 1, 1], [], []>} : vector<16x16xf32>, vector<16x128xf32>, vector<16x128xf32> -> vector<16x128xf32>
    %443 = vector.broadcast %102 : vector<16x1xf32> to vector<16x128xf32>
    %444 = arith.addf %442, %443 : vector<16x128xf32>
    %445 = arith.addf %412, %444 : vector<16x128xf32>
    %cst_91 = arith.constant 5.000000e-01 : f32
    %446 = vector.broadcast %cst_91 : f32 to vector<16x128xf32>
    %447 = arith.mulf %445, %446 : vector<16x128xf32>
    %448 = tpu.concatenate %371, %447, %42 in 0 : vector<16x128xf32>, vector<16x128xf32>, vector<16x128xf32> -> vector<48x128xf32>
    %c992 = arith.constant 992 : index
    %c0_92 = arith.constant 0 : index
    %449 = vector.load %arg3[%c992, %c0_92] : memref<1264x128xf32, #tpu.memory_space<vmem>>, vector<64x128xf32>
    %450 = vector.extract_strided_slice %449 {offsets = [0, 0], sizes = [64, 48], strides = [1, 1]} : vector<64x128xf32> to vector<64x48xf32>
    %cst_93 = arith.constant dense<0.000000e+00> : vector<64x128xf32>
    %451 = tpu.matmul %450, %448, %cst_93 {dimension_numbers = #tpu.dot_dimension_numbers<[1], [0], [0], [1], [0, 0, 1, 1], [], []>} : vector<64x48xf32>, vector<48x128xf32>, vector<64x128xf32> -> vector<64x128xf32>
    %c1056 = arith.constant 1056 : index
    %c0_94 = arith.constant 0 : index
    %452 = vector.load %arg3[%c1056, %c0_94] : memref<1264x128xf32, #tpu.memory_space<vmem>>, vector<64x128xf32>
    %453 = vector.extract_strided_slice %452 {offsets = [0, 0], sizes = [64, 1], strides = [1, 1]} : vector<64x128xf32> to vector<64x1xf32>
    %454 = vector.broadcast %453 : vector<64x1xf32> to vector<64x128xf32>
    %455 = arith.addf %451, %454 : vector<64x128xf32>
    %c1120 = arith.constant 1120 : index
    %c0_95 = arith.constant 0 : index
    %456 = vector.load %arg3[%c1120, %c0_95] : memref<1264x128xf32, #tpu.memory_space<vmem>>, vector<64x128xf32>
    %457 = vector.extract_strided_slice %456 {offsets = [0, 0], sizes = [64, 1], strides = [1, 1]} : vector<64x128xf32> to vector<64x1xf32>
    %458 = vector.broadcast %457 : vector<64x1xf32> to vector<64x128xf32>
    %459 = arith.mulf %455, %458 : vector<64x128xf32>
    %c1184 = arith.constant 1184 : index
    %c0_96 = arith.constant 0 : index
    %460 = vector.load %arg3[%c1184, %c0_96] : memref<1264x128xf32, #tpu.memory_space<vmem>>, vector<64x128xf32>
    %461 = vector.extract_strided_slice %460 {offsets = [0, 0], sizes = [64, 1], strides = [1, 1]} : vector<64x128xf32> to vector<64x1xf32>
    %462 = vector.broadcast %461 : vector<64x1xf32> to vector<64x128xf32>
    %463 = arith.addf %459, %462 : vector<64x128xf32>
    %cst_97 = arith.constant 0.000000e+00 : f32
    %464 = vector.broadcast %cst_97 : f32 to vector<64x128xf32>
    %465 = arith.maximumf %463, %464 : vector<64x128xf32>
    %c1248 = arith.constant 1248 : index
    %c0_98 = arith.constant 0 : index
    %466 = vector.load %arg3[%c1248, %c0_98] : memref<1264x128xf32, #tpu.memory_space<vmem>>, vector<8x128xf32>
    %467 = vector.extract_strided_slice %466 {offsets = [0, 0], sizes = [8, 64], strides = [1, 1]} : vector<8x128xf32> to vector<8x64xf32>
    %cst_99 = arith.constant dense<0.000000e+00> : vector<8x128xf32>
    %468 = tpu.matmul %467, %465, %cst_99 {dimension_numbers = #tpu.dot_dimension_numbers<[1], [0], [0], [1], [0, 0, 1, 1], [], []>} : vector<8x64xf32>, vector<64x128xf32>, vector<8x128xf32> -> vector<8x128xf32>
    %c1256 = arith.constant 1256 : index
    %c0_100 = arith.constant 0 : index
    %469 = vector.load %arg3[%c1256, %c0_100] : memref<1264x128xf32, #tpu.memory_space<vmem>>, vector<8x128xf32>
    %470 = vector.extract_strided_slice %469 {offsets = [0, 0], sizes = [8, 1], strides = [1, 1]} : vector<8x128xf32> to vector<8x1xf32>
    %471 = vector.broadcast %470 : vector<8x1xf32> to vector<8x128xf32>
    %472 = arith.addf %468, %471 : vector<8x128xf32>
    %c0_101 = arith.constant 0 : index
    %c0_102 = arith.constant 0 : index
    %473 = vector.load %arg4[%c0_101, %c0_102] : memref<8x128xf32, #tpu.memory_space<vmem>>, vector<8x128xf32>
    tpu.vector_store %arg4[%c0_101, %c0_102], %472 {strides = array<i32>} : memref<8x128xf32, #tpu.memory_space<vmem>>, vector<8x128xf32>,
    return
  }
  func.func @transform_0(%arg0: i32) -> (i32, i32) {
    %c0_i32 = arith.constant 0 : i32
    %c0_i32_0 = arith.constant 0 : i32
    return %c0_i32, %arg0 : i32, i32
  }
  func.func @transform_1(%arg0: i32) -> (i32, i32) {
    %c0_i32 = arith.constant 0 : i32
    %c0_i32_0 = arith.constant 0 : i32
    return %c0_i32, %arg0 : i32, i32
  }
  func.func @transform_2(%arg0: i32) -> (i32, i32) {
    %c0_i32 = arith.constant 0 : i32
    %c0_i32_0 = arith.constant 0 : i32
    %c0_i32_1 = arith.constant 0 : i32
    return %c0_i32, %c0_i32_0 : i32, i32
  }
  func.func @transform_3(%arg0: i32) -> (i32, i32) {
    %c0_i32 = arith.constant 0 : i32
    %c0_i32_0 = arith.constant 0 : i32
    return %c0_i32, %arg0 : i32, i32
  }
}

</mosaic_0001>

<bundles_post_ra>
// kernel: tpu_custom_call.1
= control target key start
LH: loop header
LB: loop body
LE: loop exit
PB: predicated region body
PF: predicated region fallthrough
CT: control target
= control target key end

     0   :  { %8 = vsyncpa [#allocation3], 0  ;;  %s2470_s0 = inlined_call_operand.hbm [shape: f32[3,128], index: 0, kind: input, shape index: {}]   ;;  %s2471_s1 = inlined_call_operand.hbm [shape: f32[32,128], index: 1, kind: input, shape index: {}]   ;;  %s2472_s2 = inlined_call_operand.hbm [shape: f32[1264,128], index: 2, kind: input, shape index: {}]   ;;  %s2473_s3 = inlined_call_operand.hbm [shape: f32[8,128], index: 3, kind: output, shape index: {}]  }
   0x1   :  { %9 = vsyncpa [#allocation6], 0  ;;  %s26_s14 = sshll.u32 %s2471_s1, 4  ;;  %s27_s14 = int_to_ptr.hbm [resolvable:$true] %s26_s14 }
   0x2   :  { %10 = vsyncpa [#allocation4], 0  ;;  %s2129_s15 = smov [#allocation5]   ;;  %s16_s19 = sshll.u32 %s2470_s0, 4  ;;  %s17_s19 = int_to_ptr.hbm [resolvable:$true] %s16_s19 }
   0x3   :  { %s28_s16 = sshll.u32 %s2129_s15, 4  ;;  %s2130_s20 = smov 128   ;;  %s29_s16 = int_to_ptr.vmem [resolvable:$true] %s28_s16 }
   0x4   :  { %s2131_s21 = smov 8   ;;  %s2132_s22 = smov [#allocation2]  }
   0x5   :  { %34 = dma.hbm_to_vmem [thread:$0]  %s27_s14, 512, %s29_s16, [#allocation6], %s2130_s20, %s2130_s20, %s2131_s21  }
   0x6   :  { %s18_s23 = sshll.u32 %s2132_s22, 4  ;;  %s39_s26 = sshll.u32 %s2472_s2, 4  ;;  %s19_s23 = int_to_ptr.vmem [resolvable:$true] %s18_s23  ;;  %s40_s26 = int_to_ptr.hbm [resolvable:$true] %s39_s26 }
   0x7   :  { %21 = dma.hbm_to_vmem [thread:$0]  %s17_s19, 64, %s19_s23, [#allocation3]  }
   0x8   :  { %s2133_s1 = smov [#allocation7]  }
   0x9   :  { %s41_s27 = sshll.u32 %s2133_s1, 4  ;;  %s42_s27 = int_to_ptr.vmem [resolvable:$true] %s41_s27 }
   0xa   :  { %47 = dma.hbm_to_vmem [thread:$0]  %s40_s26, 20224, %s42_s27, [#allocation6], %s2130_s20, %s2130_s20, %s2131_s21  }
   0xb   :  { %2123 = dma.done.wait [#allocation3], 64  }
   0xc   :  { %2124 = vsyncadd [#allocation3], 4294967232 }
   0xd   :  { %2125 = dma.done.wait [#allocation6], 20736  }
   0xe   :  { %2126 = vsyncadd [#allocation6], 4294946560  ;;  %v2134_v0 = vmov 1   ;;  %v2135_v1 = vmov 0   ;;  %v145_v2 = vld [vmem:[#allocation7 + $0x38] sm:$0xff]  ;;  %v66_v4 = vld [vmem:[#allocation7 + $0x8] sm:$0xff] }
   0xf   :  { %1955 = vset.pattern.permute.xlu1 %v2134_v0  ;;  %1954 = vset.pattern.permute.xlu0 %v2134_v0  ;;  %v68_v3 = vld [vmem:[#allocation7 + $0x18] sm:$0xff]  ;;  %v63_v6 = vld [vmem:[#allocation5 + $0x10] sm:$0xff]  ;;  %v62_v7 = vld [vmem:[#allocation5 + $0x8] sm:$0xff]  ;;  %vm156_vm0 = vcmask 261120   ;;  %v2136_v14 = vmov 2   ;;  %vm228_vm1 = vcmask 130048  }
  0x10   :  { %1956 = vset.pattern.permute.xlu2 %v2135_v1  ;;  %112 = vperm.xlu1 %1955, %v68_v3   ;;  %v64_v5 = vld [vmem:[#allocation5 + $0x18] sm:$0xff]  ;;  %v61_v8 = vld [vmem:[#allocation5] sm:$0xff]  ;;  %v144_v10 = vld [vmem:[#allocation7 + $0x30] sm:$0xff]  ;;  %vm661_vm2 = vcmask 392192   ;;  %vm848_vm3 = vcmask 916480   ;;  %vm1359_vm4 = vcmask 523264  }
  0x11   :  { %153 = vperm.xlu2 %1956, %v145_v2   ;;  %101 = vperm.xlu0 %1954, %v66_v4   ;;  %v142_v9 = vld [vmem:[#allocation7 + $0x20] sm:$0xff]  ;;  %v67_v11 = vld [vmem:[#allocation7 + $0x10] sm:$0xff]  ;;  %v143_v13 = vld [vmem:[#allocation7 + $0x28] sm:$0xff]  ;;  %s2137_s0 = smov [#allocation8]   ;;  %s1843_s30 = sshll.u32 %s2473_s3, 4  ;;  %s1844_s30 = int_to_ptr.hbm [resolvable:$true] %s1843_s30 }
  0x12   :  { %175 = vmatpush.msra.mxu0 %v64_v5  ;;  %v65_v12 = vld [vmem:[#allocation7] sm:$0xff]  ;;  %v445_v15 = vld [vmem:[#allocation7 + $0x1e8] sm:$0xff]  ;;  %v446_v16 = vld [vmem:[#allocation7 + $0x1f0] sm:$0xff]  ;;  %s1841_s2 = sshll.u32 %s2137_s0, 4  ;;  %s1842_s2 = int_to_ptr.vmem [resolvable:$true] %s1841_s2 }
  0x13   :  { %v447_v17 = vld [vmem:[#allocation7 + $0x1f8] sm:$0xff]  ;;  %v442_v18 = vld [vmem:[#allocation7 + $0x1d0] sm:$0xff]  ;;  %v444_v20 = vld [vmem:[#allocation7 + $0x1e0] sm:$0xff] }
  0x14   :  { %176 = vmatpush.msra.mxu0 %v63_v6  ;;  %v443_v19 = vld [vmem:[#allocation7 + $0x1d8] sm:$0xff]  ;;  %v440_v22 = vld [vmem:[#allocation7 + $0x1c0] sm:$0xff]  ;;  %v441_v23 = vld [vmem:[#allocation7 + $0x1c8] sm:$0xff] }
  0x15   :  { %v439_v21 = vld [vmem:[#allocation7 + $0x1b8] sm:$0xff]  ;;  %v436_v24 = vld [vmem:[#allocation7 + $0x1a0] sm:$0xff]  ;;  %v437_v25 = vld [vmem:[#allocation7 + $0x1a8] sm:$0xff] }
  0x16   :  { %177 = vmatpush.msra.mxu0 %v62_v7  ;;  %v438_v26 = vld [vmem:[#allocation7 + $0x1b0] sm:$0xff]  ;;  %v293_v27 = vld [vmem:[#allocation7 + $0xf8] sm:$0xff]  ;;  %v290_v30 = vld [vmem:[#allocation7 + $0xe0] sm:$0xff] }
  0x17   :  { %v434_v28 = vld [vmem:[#allocation7 + $0x190] sm:$0xff]  ;;  %v435_v29 = vld [vmem:[#allocation7 + $0x198] sm:$0xff]  ;;  %v291_v31 = vld [vmem:[#allocation7 + $0xe8] sm:$0xff] }
  0x18   :  { %178 = vmatpush.msra.mxu0 %v61_v8  ;;  %108 = vperm.xlu1 %1955, %v67_v11   ;;  %v292_v32 = vld [vmem:[#allocation7 + $0xf0] sm:$0xff]  ;;  %v197_v33 = vld [vmem:[#allocation7 + $0x98] sm:$0xff]  ;;  %v194_v36 = vld [vmem:[#allocation7 + $0x80] sm:$0xff] }
  0x19   :  { %1854 = vmatmul.msk.f32.vlgmr.msra.gmra.mxu0 %vm156_vm0, %v142_v9  ;;  %148 = vperm.xlu2 %1956, %v144_v10   ;;  %v288_v34 = vld [vmem:[#allocation7 + $0xd0] sm:$0xff]  ;;  %v289_v35 = vld [vmem:[#allocation7 + $0xd8] sm:$0xff]  ;;  %v195_v37 = vld [vmem:[#allocation7 + $0x88] sm:$0xff] }
  0x1a   :  { %97 = vperm.xlu0 %1954, %v65_v12   ;;  %v196_v38 = vld [vmem:[#allocation7 + $0x90] sm:$0xff]  ;;  %v626_v39 = vld [vmem:[#allocation7 + $0x238] sm:$0xff]  ;;  %v628_v47 = vld [vmem:[#allocation7 + $0x248] sm:$0xff] }
  0x1b   :  { %v192_v40 = vld [vmem:[#allocation7 + $0x70] sm:$0xff]  ;;  %v193_v41 = vld [vmem:[#allocation7 + $0x78] sm:$0xff]  ;;  %v627_v56 = vld [vmem:[#allocation7 + $0x240] sm:$0xff] }
  0x1c   :  { %v625_v42 = vld [vmem:[#allocation7 + $0x230] sm:$0xff]  ;;  %v2169_v44 = vld [vmem:[#allocation2] sm:$0x7]  ;;  %v771_v57 = vld [vmem:[#allocation7 + $0x308] sm:$0xff] }
  0x1d   :  { %v773_v45 = vld [vmem:[#allocation7 + $0x318] sm:$0xff]  ;;  %v104_v46 = vperm.slane %v2169_v44, 1  ;;  %v772_v55 = vld [vmem:[#allocation7 + $0x310] sm:$0xff]  ;;  %v767_v0 = vld [vmem:[#allocation7 + $0x2e8] sm:$0xff] }
  0x1e   :  { %v765_v48 = vld [vmem:[#allocation7 + $0x2d8] sm:$0xff]  ;;  %v770_v9 = vld [vmem:[#allocation7 + $0x300] sm:$0xff] }
  0x1f   :  { %v380_v2 = vld [vmem:[#allocation7 + $0x118] sm:$0xff]  ;;  %v766_v10 = vld [vmem:[#allocation7 + $0x2e0] sm:$0xff] }
  0x20   :  { %1958 = vset.pattern.permute.xlu1 %v2136_v14 }
  0x21   :  { %1855 = vmatmul.msk.f32.gmra.mxu0 %vm156_vm0, %v143_v13  ;;  %1959 = vset.pattern.permute.xlu2 %v2136_v14 }
  0x22   :  { %1957 = vset.pattern.permute.xlu0 %v2136_v14  ;;  %135 = vperm.xlu2 %1959, %v68_v3   ;;  %v775_v14 = vld [vmem:[#allocation7 + $0x328] sm:$0xff] }
  0x23   :  { %120 = vperm.xlu1 %1958, %v65_v12   ;;  %124 = vperm.xlu0 %1957, %v66_v4  }
  0x2a   :  { %1960 = vset.pattern.permute.xlu2 %v2135_v1 }
  0x2b   :  { %131 = vperm.xlu1 %1958, %v67_v11   ;;  %1961 = vset.pattern.permute.xlu0 %v2135_v1 }
  0x2c   :  { %76 = vperm.xlu2 %1960, %v66_v4   ;;  %71 = vperm.xlu0 %1961, %v65_v12   ;;  %v127_v4 = vperm.slane %v2169_v44, 2 }
  0x33   :  { %1962 = vset.pattern.permute.xlu1 %v2135_v1  ;;  %v764_v1 = vld [vmem:[#allocation7 + $0x2d0] sm:$0xff] }
  0x34   :  { %84 = vperm.xlu2 %1960, %v67_v11   ;;  %89 = vperm.xlu1 %1962, %v68_v3   ;;  %v377_v3 = vld [vmem:[#allocation7 + $0x100] sm:$0xff] }
  0x35   :  { %505 = vperm.xlu0 %1961, %v445_v15   ;;  %v378_v15 = vld [vmem:[#allocation7 + $0x108] sm:$0xff] }
  0x3c   :  { %510 = vperm.xlu2 %1960, %v446_v16   ;;  %515 = vperm.xlu1 %1962, %v447_v17  }
  0x3d   :  { %490 = vperm.xlu0 %1961, %v442_v18  }
  0x44   :  { %495 = vperm.xlu2 %1960, %v443_v19   ;;  %500 = vperm.xlu1 %1962, %v444_v20   ;;  %v79_v19 = vperm.slane %v2169_v44, 0  ;;  %v425_v44 = vld [vmem:[#allocation7 + $0x148] sm:$0xff] }
  0x45   :  { %475 = vperm.xlu0 %1961, %v439_v21  }
  0x4c   :  { %480 = vperm.xlu2 %1960, %v440_v22   ;;  %485 = vperm.xlu1 %1962, %v441_v23  }
  0x4d   :  { %460 = vperm.xlu0 %1961, %v436_v24  }
  0x54   :  { %465 = vperm.xlu2 %1960, %v437_v25   ;;  %470 = vperm.xlu1 %1962, %v438_v26   ;;  %v186_v25 = vld [vmem:[#allocation7 + $0x40] sm:$0xff] }
  0x55   :  { %321 = vperm.xlu0 %1961, %v293_v27  }
  0x5c   :  { %450 = vperm.xlu2 %1960, %v434_v28   ;;  %455 = vperm.xlu1 %1962, %v435_v29   ;;  %v630_v28 = vld [vmem:[#allocation7 + $0x258] sm:$0xff]  ;;  %v379_v29 = vld [vmem:[#allocation7 + $0x110] sm:$0xff] }
  0x5d   :  { %306 = vperm.xlu0 %1961, %v290_v30  }
  0x64   :  { %311 = vperm.xlu2 %1960, %v291_v31   ;;  %316 = vperm.xlu1 %1962, %v292_v32   ;;  %v769_v31 = vld [vmem:[#allocation7 + $0x2f8] sm:$0xff]  ;;  %v420_v32 = vld [vmem:[#allocation7 + $0x120] sm:$0xff] }
  0x65   :  { %225 = vperm.xlu0 %1961, %v197_v33   ;;  %v424_v33 = vld [vmem:[#allocation7 + $0x140] sm:$0xff] }
  0x6b   :  { %v2167_v43 = vpop.permute.xlu2 %153 }
  0x6c   :  { %296 = vperm.xlu2 %1960, %v288_v34   ;;  %301 = vperm.xlu1 %1962, %v289_v35  }
  0x6d   :  { %210 = vperm.xlu0 %1961, %v194_v36  }
  0x73   :  { %v149_v52 = vpop.permute.xlu2 %148 }
  0x74   :  { %215 = vperm.xlu2 %1960, %v195_v37   ;;  %220 = vperm.xlu1 %1962, %v196_v38   ;;  %v187_v37 = vld [vmem:[#allocation7 + $0x48] sm:$0xff] }
  0x75   :  { %638 = vperm.xlu0 %1961, %v626_v39  }
  0x7c   :  { %200 = vperm.xlu2 %1960, %v192_v40   ;;  %205 = vperm.xlu1 %1962, %v193_v41   ;;  %v136_v62 = vpop.permute.xlu2 %135  ;;  %v774_v40 = vld [vmem:[#allocation7 + $0x320] sm:$0xff]  ;;  %v629_v41 = vld [vmem:[#allocation7 + $0x250] sm:$0xff] }
  0x7d   :  { %633 = vperm.xlu0 %1961, %v625_v42   ;;  %v995_v42 = vld [vmem:[#allocation7 + $0x3b0] sm:$0xff] }
  0x82   :  { %v113_v49 = vpop.permute.xlu1 %112 }
  0x83   :  { %v102_v50 = vpop.permute.xlu0 %101 }
  0x84   :  { %825 = vperm.xlu2 %1960, %v773_v45   ;;  %648 = vperm.xlu1 %1962, %v628_v47   ;;  %v106_v51 = vmul.f32 %v104_v46, %v102_v50  ;;  %v282_v45 = vld [vmem:[#allocation7 + $0xa0] sm:$0xff]  ;;  %v996_v47 = vld [vmem:[#allocation7 + $0x3b8] sm:$0xff]  ;;  %v426_v50 = vld [vmem:[#allocation7 + $0x150] sm:$0xff] }
  0x85   :  { %785 = vperm.xlu0 %1961, %v765_v48   ;;  %v768_v48 = vld [vmem:[#allocation7 + $0x2f0] sm:$0xff] }
  0x86   :  { %v116_v53 = vadd.f32 %v113_v49, %v106_v51  ;;  %v77_v12 = vpop.permute.xlu2 %76  ;;  %v953_v49 = vld [vmem:[#allocation7 + $0x358] sm:$0xff]  ;;  %v283_v51 = vld [vmem:[#allocation7 + $0xa8] sm:$0xff] }
  0x87   :  { %v81_v27 = vmul.f32 %v79_v19, %v77_v12  ;;  %v287_v12 = vld [vmem:[#allocation7 + $0xc8] sm:$0xff] }
  0x88   :  { %v118_v54 = vmax.f32 %v116_v53, 0.0  ;;  %v1347_v53 = vld [vmem:[#allocation7 + $0x3d0] sm:$0xff] }
  0x8a   :  { %411 = vmatpush.msra.mxu3 %v118_v54  ;;  %v109_v58 = vpop.permute.xlu1 %108  ;;  %v1348_v54 = vld [vmem:[#allocation7 + $0x3d8] sm:$0xff] }
  0x8c   :  { %820 = vperm.xlu2 %1960, %v772_v55   ;;  %643 = vperm.xlu1 %1962, %v627_v56   ;;  %v98_v59 = vpop.permute.xlu0 %97  ;;  %v1393_v55 = vld [vmem:[#allocation7 + $0x380] sm:$0xff]  ;;  %v427_v56 = vld [vmem:[#allocation7 + $0x158] sm:$0xff] }
  0x8d   :  { %815 = vperm.xlu0 %1961, %v771_v57   ;;  %v105_v60 = vmul.f32 %v104_v46, %v98_v59  ;;  %v188_v46 = vld [vmem:[#allocation7 + $0x50] sm:$0xff] }
  0x8e   :  { %v85_v30 = vpop.permute.xlu2 %84  ;;  %v284_v57 = vld [vmem:[#allocation7 + $0xb0] sm:$0xff] }
  0x8f   :  { %v115_v61 = vadd.f32 %v109_v58, %v105_v60  ;;  %v190_v58 = vld [vmem:[#allocation7 + $0x60] sm:$0xff]  ;;  %v952_v59 = vld [vmem:[#allocation7 + $0x350] sm:$0xff]  ;;  %v1394_v60 = vld [vmem:[#allocation7 + $0x388] sm:$0xff] }
  0x91   :  { %v117_v63 = vmax.f32 %v115_v61, 0.0  ;;  %v1396_v61 = vld [vmem:[#allocation7 + $0x398] sm:$0xff] }
  0x93   :  { %412 = vmatpush.msra.mxu3 %v117_v63  ;;  %v285_v63 = vld [vmem:[#allocation7 + $0xb8] sm:$0xff] }
  0x94   :  { %795 = vperm.xlu2 %1960, %v767_v0   ;;  %780 = vperm.xlu1 %1962, %v764_v1   ;;  %v191_v0 = vld [vmem:[#allocation7 + $0x68] sm:$0xff]  ;;  %v776_v1 = vld [vmem:[#allocation7 + $0x330] sm:$0xff] }
  0x95   :  { %388 = vperm.xlu0 %1961, %v380_v2   ;;  %1868 = vmatmul.msk.f32.vlgmr.msra.gmra.mxu3 %vm228_vm1, %v377_v3  ;;  %v121_v5 = vpop.permute.xlu1 %120  ;;  %v125_v6 = vpop.permute.xlu0 %124  ;;  %v777_v2 = vld [vmem:[#allocation7 + $0x338] sm:$0xff]  ;;  %v1578_v3 = vld [vmem:[#allocation7 + $0x450] sm:$0xff] }
  0x96   :  { %v129_v7 = vmul.f32 %v127_v4, %v125_v6  ;;  %v180_v8 = vpop.f32.mrf.mxu0  ;;  %v128_v13 = vmul.f32 %v127_v4, %v121_v5  ;;  %v429_v4 = vld [vmem:[#allocation7 + $0x168] sm:$0xff]  ;;  %v286_v5 = vld [vmem:[#allocation7 + $0xc0] sm:$0xff]  ;;  %v422_v6 = vld [vmem:[#allocation7 + $0x130] sm:$0xff] }
  0x97   :  { %v2179_v26 = vadd.f32 %v180_v8, %v149_v52  ;;  %v189_v52 = vld [vmem:[#allocation7 + $0x58] sm:$0xff]  ;;  %v1395_v8 = vld [vmem:[#allocation7 + $0x390] sm:$0xff] }
  0x98   :  { %v139_v11 = vadd.f32 %v136_v62, %v129_v7  ;;  %v428_v62 = vld [vmem:[#allocation7 + $0x160] sm:$0xff]  ;;  %v1579_v7 = vld [vmem:[#allocation7 + $0x458] sm:$0xff] }
  0x9a   :  { %v141_v16 = vmax.f32 %v139_v11, 0.0  ;;  %v430_v11 = vld [vmem:[#allocation7 + $0x170] sm:$0xff] }
  0x9c   :  { %810 = vperm.xlu2 %1960, %v770_v9   ;;  %790 = vperm.xlu1 %1962, %v766_v10   ;;  %v1691_v10 = vld [vmem:[#allocation7 + $0x490] sm:$0xff] }
  0x9d   :  { %835 = vperm.xlu0 %1961, %v775_v14   ;;  %1869 = vmatmul.msk.f32.gmra.mxu3 %vm228_vm1, %v378_v15  ;;  %v132_v17 = vpop.permute.xlu1 %131  ;;  %v1577_v14 = vld [vmem:[#allocation7 + $0x448] sm:$0xff]  ;;  %v1692_v15 = vld [vmem:[#allocation7 + $0x498] sm:$0xff] }
  0x9e   :  { %v138_v18 = vadd.f32 %v132_v17, %v128_v13  ;;  %261 = vmatpush.msra.mxu1 %v141_v16  ;;  %v183_v20 = vpop.f32.mrf.mxu0  ;;  %v72_v22 = vpop.permute.xlu0 %71  ;;  %v423_v13 = vld [vmem:[#allocation7 + $0x138] sm:$0xff]  ;;  %v1690_v16 = vld [vmem:[#allocation7 + $0x488] sm:$0xff] }
  0x9f   :  { %v2177_v23 = vadd.f32 %v183_v20, %v2167_v43  ;;  %v80_v24 = vmul.f32 %v79_v19, %v72_v22  ;;  %v421_v43 = vld [vmem:[#allocation7 + $0x128] sm:$0xff]  ;;  %v1576_v20 = vld [vmem:[#allocation7 + $0x440] sm:$0xff] }
  0xa0   :  { %v140_v21 = vmax.f32 %v138_v18, 0.0  ;;  %v431_v18 = vld [vmem:[#allocation7 + $0x178] sm:$0xff]  ;;  %v1689_v22 = vld [vmem:[#allocation7 + $0x480] sm:$0xff] }
  0xa1   :  { %574 = vmatpush.msrb.mxu0 %v2177_v23  ;;  %1940 = vmatpush.msrb.mxu3 %v2177_v23  ;;  %v92_v34 = vadd.f32 %v85_v30, %v80_v24  ;;  %v432_v24 = vld [vmem:[#allocation7 + $0x180] sm:$0xff]  ;;  %v1688_v30 = vld [vmem:[#allocation7 + $0x478] sm:$0xff] }
  0xa2   :  { %262 = vmatpush.msra.mxu1 %v140_v21  ;;  %v1748_v21 = vld [vmem:[#allocation7 + $0x4d8] sm:$0xff] }
  0xa3   :  { %1856 = vmatmul.msk.f32.vlgmr.msra.gmra.mxu1 %vm228_vm1, %v186_v25  ;;  %575 = vmatpush.msrb.mxu0 %v2179_v26  ;;  %v94_v39 = vmax.f32 %v92_v34, 0.0  ;;  %v1574_v34 = vld [vmem:[#allocation7 + $0x430] sm:$0xff] }
  0xa4   :  { %1939 = vmatpush.msrb.mxu1 %v2177_v23  ;;  %1942 = vmatpush.msrb.mxu3 %v2179_v26 }
  0xa5   :  { %658 = vperm.xlu2 %1960, %v630_v28   ;;  %383 = vperm.xlu1 %1962, %v379_v29   ;;  %v1575_v28 = vld [vmem:[#allocation7 + $0x438] sm:$0xff]  ;;  %v1747_v29 = vld [vmem:[#allocation7 + $0x4d0] sm:$0xff] }
  0xa6   :  { %v90_v35 = vpop.permute.xlu1 %89  ;;  %805 = vperm.xlu0 %1961, %v769_v31   ;;  %1870 = vmatmul.msk.f32.vlgmr.msrb.gmra.mxu0 %vm228_vm1, %v420_v32  ;;  %v433_v31 = vld [vmem:[#allocation7 + $0x188] sm:$0xff] }
  0xa7   :  { %v93_v36 = vadd.f32 %v90_v35, %v81_v27  ;;  %1874 = vmatmul.msk.f32.vlgmr.msrb.gmra.mxu3 %vm228_vm1, %v424_v33  ;;  %1941 = vmatpush.msrb.mxu1 %v2179_v26  ;;  %v2212_v17 = vpop.permute.xlu0 %505  ;;  %v1746_v35 = vld [vmem:[#allocation7 + $0x4c8] sm:$0xff] }
  0xa9   :  { %v95_v38 = vmax.f32 %v93_v36, 0.0  ;;  %v1687_v36 = vld [vmem:[#allocation7 + $0x470] sm:$0xff] }
  0xab   :  { %356 = vmatpush.msra.mxu2 %v95_v38  ;;  %1857 = vmatmul.msk.f32.gmra.mxu1 %vm228_vm1, %v187_v37  ;;  %v1573_v38 = vld [vmem:[#allocation7 + $0x428] sm:$0xff] }
  0xad   :  { %357 = vmatpush.msra.mxu2 %v94_v39  ;;  %830 = vperm.xlu2 %1960, %v774_v40   ;;  %v1745_v39 = vld [vmem:[#allocation7 + $0x4c0] sm:$0xff] }
  0xae   :  { %653 = vperm.xlu1 %1962, %v629_v41   ;;  %1059 = vperm.xlu0 %1961, %v995_v42   ;;  %v2206_v9 = vpop.permute.xlu1 %515  ;;  %v1686_v41 = vld [vmem:[#allocation7 + $0x468] sm:$0xff]  ;;  %v1572_v42 = vld [vmem:[#allocation7 + $0x420] sm:$0xff] }
  0xaf   :  { %1871 = vmatmul.msk.f32.gmra.mxu0 %vm228_vm1, %v421_v43  ;;  %1875 = vmatmul.msk.f32.gmra.mxu3 %vm228_vm1, %v425_v44  ;;  %v2217_v25 = vpop.permute.xlu0 %490  ;;  %v1744_v43 = vld [vmem:[#allocation7 + $0x4b8] sm:$0xff]  ;;  %v2231_v44 = vpop.permute.xlu2 %510 }
  0xb0   :  { %1862 = vmatmul.msk.f32.vlgmr.msra.gmra.mxu2 %vm228_vm1, %v282_v45  ;;  %v1742_v45 = vld [vmem:[#allocation7 + $0x4a8] sm:$0xff] }
  0xb3   :  { %1858 = vmatmul.msk.f32.gmra.mxu1 %vm228_vm1, %v188_v46 }
  0xb5   :  { %1064 = vperm.xlu2 %1960, %v996_v47  }
  0xb6   :  { %800 = vperm.xlu1 %1962, %v768_v48   ;;  %961 = vperm.xlu0 %1961, %v953_v49   ;;  %v2214_v19 = vpop.permute.xlu1 %500  ;;  %v1685_v48 = vld [vmem:[#allocation7 + $0x460] sm:$0xff]  ;;  %v1743_v49 = vld [vmem:[#allocation7 + $0x4b0] sm:$0xff] }
  0xb7   :  { %1876 = vmatmul.msk.f32.gmra.mxu3 %vm228_vm1, %v426_v50  ;;  %v2223_v32 = vpop.permute.xlu0 %475  ;;  %v2237_v50 = vpop.permute.xlu2 %495 }
  0xb8   :  { %1863 = vmatmul.msk.f32.gmra.mxu2 %vm228_vm1, %v283_v51 }
  0xbb   :  { %1859 = vmatmul.msk.f32.gmra.mxu1 %vm228_vm1, %v189_v52 }
  0xbd   :  { %1351 = vperm.xlu2 %1960, %v1347_v53   ;;  %v1806_v53 = vld [vmem:[#allocation7 + $0x4e8] sm:$0xff] }
  0xbe   :  { %1356 = vperm.xlu1 %1962, %v1348_v54   ;;  %1399 = vperm.xlu0 %1961, %v1393_v55   ;;  %v2219_v27 = vpop.permute.xlu1 %485  ;;  %v1741_v54 = vld [vmem:[#allocation7 + $0x4a0] sm:$0xff] }
  0xbf   :  { %1877 = vmatmul.msk.f32.gmra.mxu3 %vm228_vm1, %v427_v56  ;;  %v2227_v37 = vpop.permute.xlu0 %460  ;;  %v2243_v55 = vpop.permute.xlu2 %480 }
  0xc0   :  { %1864 = vmatmul.msk.f32.gmra.mxu2 %vm228_vm1, %v284_v57 }
  0xc3   :  { %1860 = vmatmul.msk.f32.gmra.mxu1 %vm228_vm1, %v190_v58 }
  0xc5   :  { %956 = vperm.xlu2 %1960, %v952_v59  }
  0xc6   :  { %1404 = vperm.xlu1 %1962, %v1394_v60   ;;  %1414 = vperm.xlu0 %1961, %v1396_v61   ;;  %v2225_v33 = vpop.permute.xlu1 %470 }
  0xc7   :  { %1878 = vmatmul.msk.f32.gmra.mxu3 %vm228_vm1, %v428_v62  ;;  %v2233_v46 = vpop.permute.xlu0 %321  ;;  %v2245_v60 = vpop.permute.xlu2 %465 }
  0xc8   :  { %1865 = vmatmul.msk.f32.gmra.mxu2 %vm228_vm1, %v285_v63 }
  0xcb   :  { %1861 = vmatmul.msk.f32.gmra.mxu1 %vm228_vm1, %v191_v0 }
  0xcd   :  { %840 = vperm.xlu2 %1960, %v776_v1  }
  0xce   :  { %845 = vperm.xlu1 %1962, %v777_v2   ;;  %1612 = vperm.xlu0 %1961, %v1578_v3   ;;  %v2229_v40 = vpop.permute.xlu1 %455 }
  0xcf   :  { %1879 = vmatmul.msk.f32.gmra.mxu3 %vm228_vm1, %v429_v4  ;;  %v2239_v51 = vpop.permute.xlu0 %306  ;;  %v2249_v2 = vpop.permute.xlu2 %450 }
  0xd0   :  { %1866 = vmatmul.msk.f32.gmra.mxu2 %vm228_vm1, %v286_v5 }
  0xd3   :  { %1872 = vmatmul.msk.f32.vlgmr.msrb.gmra.mxu1 %vm228_vm1, %v422_v6 }
  0xd5   :  { %1617 = vperm.xlu2 %1960, %v1579_v7  }
  0xd6   :  { %1409 = vperm.xlu1 %1962, %v1395_v8   ;;  %1725 = vperm.xlu0 %1961, %v1691_v10   ;;  %v2235_v47 = vpop.permute.xlu1 %316 }
  0xd7   :  { %1880 = vmatmul.msk.f32.gmra.mxu3 %vm228_vm1, %v430_v11  ;;  %v226_v56 = vpop.permute.xlu0 %225  ;;  %v312_v8 = vpop.permute.xlu2 %311 }
  0xd8   :  { %1867 = vmatmul.msk.f32.gmra.mxu2 %vm228_vm1, %v287_v12 }
  0xdb   :  { %1873 = vmatmul.msk.f32.gmra.mxu1 %vm228_vm1, %v423_v13 }
  0xdd   :  { %1607 = vperm.xlu2 %1960, %v1577_v14  }
  0xde   :  { %1730 = vperm.xlu1 %1962, %v1692_v15   ;;  %1720 = vperm.xlu0 %1961, %v1690_v16   ;;  %v2241_v52 = vpop.permute.xlu1 %301 }
  0xdf   :  { %1881 = vmatmul.msk.f32.gmra.mxu3 %vm228_vm1, %v431_v18  ;;  %v211_v62 = vpop.permute.xlu0 %210  ;;  %v297_v15 = vpop.permute.xlu2 %296 }
  0xe5   :  { %1602 = vperm.xlu2 %1960, %v1576_v20  }
  0xe6   :  { %1786 = vperm.xlu1 %1962, %v1748_v21   ;;  %1715 = vperm.xlu0 %1961, %v1689_v22   ;;  %v221_v58 = vpop.permute.xlu1 %220 }
  0xe7   :  { %1882 = vmatmul.msk.f32.gmra.mxu3 %vm228_vm1, %v432_v24  ;;  %v2251_v3 = vpop.permute.xlu0 %638  ;;  %v216_v24 = vpop.permute.xlu2 %215 }
  0xed   :  { %1597 = vperm.xlu2 %1960, %v1575_v28  }
  0xee   :  { %1781 = vperm.xlu1 %1962, %v1747_v29   ;;  %1710 = vperm.xlu0 %1961, %v1688_v30   ;;  %v206_v63 = vpop.permute.xlu1 %205 }
  0xef   :  { %1883 = vmatmul.msk.f32.gmra.mxu3 %vm228_vm1, %v433_v31  ;;  %v2257_v10 = vpop.permute.xlu0 %633 }
  0xf5   :  { %1592 = vperm.xlu2 %1960, %v1574_v34  }
  0xf6   :  { %1776 = vperm.xlu1 %1962, %v1746_v35   ;;  %1705 = vperm.xlu0 %1961, %v1687_v36   ;;  %v2253_v4 = vpop.permute.xlu1 %648 }
  0xf7   :  { %v2263_v16 = vpop.permute.xlu0 %785 }
  0xfd   :  { %1587 = vperm.xlu2 %1960, %v1573_v38  }
  0xfe   :  { %1771 = vperm.xlu1 %1962, %v1745_v39   ;;  %1700 = vperm.xlu0 %1961, %v1686_v41   ;;  %v2259_v11 = vpop.permute.xlu1 %643 }
  0xff   :  { %v2271_v34 = vpop.permute.xlu0 %815 }
 0x105   :  { %1582 = vperm.xlu2 %1960, %v1572_v42  }
 0x106   :  { %1766 = vperm.xlu1 %1962, %v1744_v43   ;;  %1756 = vperm.xlu0 %1961, %v1742_v45   ;;  %v2265_v18 = vpop.permute.xlu1 %780  ;;  %v201_v45 = vpop.permute.xlu2 %200 }
 0x10d   :  { %1695 = vperm.xlu2 %1960, %v1685_v48  }
 0x10e   :  { %1761 = vperm.xlu1 %1962, %v1743_v49   ;;  %v2273_v35 = vpop.permute.xlu1 %790  ;;  %v619_v49 = vld [vmem:[#allocation7 + $0x200] sm:$0xff] }
 0x115   :  { %1809 = vperm.xlu2 %1960, %v1806_v53   ;;  %v389_v53 = vpop.permute.xlu0 %388 }
 0x116   :  { %1751 = vperm.xlu1 %1962, %v1741_v54  }
 0x117   :  { %v384_v54 = vpop.permute.xlu1 %383 }
 0x118   :  { %v414_v57 = vpop.f32.mrf.mxu3 }
 0x120   :  { %v417_v59 = vpop.f32.mrf.mxu3  ;;  %v264_v61 = vpop.f32.mrf.mxu1 }
 0x121   :  { %v265_v48 = vadd.f32 %v264_v61, %v201_v45  ;;  %v761_v45 = vld [vmem:[#allocation7 + $0x2b8] sm:$0xff] }
 0x128   :  { %v267_v0 = vpop.f32.mrf.mxu1 }
 0x129   :  { %v268_v41 = vadd.f32 %v267_v0, %v206_v63  ;;  %v620_v0 = vld [vmem:[#allocation7 + $0x208] sm:$0xff] }
 0x12a   :  { %v2247_v1 = vpop.f32.mrf.mxu3 }
 0x130   :  { %v270_v5 = vpop.f32.mrf.mxu1 }
 0x131   :  { %v271_v39 = vadd.f32 %v270_v5, %v211_v62 }
 0x132   :  { %v2255_v6 = vpop.f32.mrf.mxu3 }
 0x133   :  { %v359_v7 = vpop.f32.mrf.mxu2 }
 0x138   :  { %v273_v12 = vpop.f32.mrf.mxu1 }
 0x139   :  { %v274_v38 = vadd.f32 %v273_v12, %v216_v24  ;;  %v621_v24 = vld [vmem:[#allocation7 + $0x210] sm:$0xff] }
 0x13a   :  { %v2261_v13 = vpop.f32.mrf.mxu3 }
 0x13b   :  { %v362_v14 = vpop.f32.mrf.mxu2 }
 0x140   :  { %v276_v20 = vpop.f32.mrf.mxu1 }
 0x141   :  { %v277_v36 = vadd.f32 %v276_v20, %v221_v58  ;;  %v415_v58 = vadd.f32 %v414_v57, %v384_v54  ;;  %v363_v57 = vadd.f32 %v362_v14, %v2241_v52 }
 0x142   :  { %v2267_v21 = vpop.f32.mrf.mxu3 }
 0x143   :  { %v365_v22 = vpop.f32.mrf.mxu2 }
 0x148   :  { %v279_v28 = vpop.f32.mrf.mxu1 }
 0x149   :  { %v280_v30 = vadd.f32 %v279_v28, %v226_v56  ;;  %v418_v56 = vadd.f32 %v417_v59, %v389_v53  ;;  %v366_v59 = vadd.f32 %v365_v22, %v2239_v51  ;;  %v360_v28 = vadd.f32 %v359_v7, %v297_v15  ;;  %v623_v22 = vld [vmem:[#allocation7 + $0x220] sm:$0xff] }
 0x14a   :  { %v2269_v29 = vpop.f32.mrf.mxu3 }
 0x14b   :  { %v368_v31 = vpop.f32.mrf.mxu2  ;;  %690 = vmatpush.msra.mxu0 %v280_v30 }
 0x14c   :  { %v369_v61 = vadd.f32 %v368_v31, %v312_v8  ;;  %v624_v31 = vld [vmem:[#allocation7 + $0x228] sm:$0xff] }
 0x14d   :  { %691 = vmatpush.msra.mxu0 %v277_v36 }
 0x14f   :  { %692 = vmatpush.msra.mxu0 %v274_v38  ;;  %v756_v38 = vld [vmem:[#allocation7 + $0x290] sm:$0xff] }
 0x150   :  { %v583_v15 = vpop.f32.mrf.mxu1 }
 0x151   :  { %693 = vmatpush.msra.mxu0 %v271_v39  ;;  %v757_v39 = vld [vmem:[#allocation7 + $0x298] sm:$0xff] }
 0x152   :  { %v604_v42 = vpop.f32.mrf.mxu3 }
 0x153   :  { %v371_v43 = vpop.f32.mrf.mxu2  ;;  %694 = vmatpush.msra.mxu0 %v268_v41  ;;  %v605_v30 = vadd.f32 %v604_v42, %v2237_v50  ;;  %v593_v50 = vadd.f32 %v2255_v6, %v2223_v32  ;;  %v951_v6 = vld [vmem:[#allocation7 + $0x348] sm:$0xff]  ;;  %v758_v41 = vld [vmem:[#allocation7 + $0x2a0] sm:$0xff] }
 0x154   :  { %v372_v5 = vadd.f32 %v371_v43, %v2235_v47  ;;  %v622_v47 = vld [vmem:[#allocation7 + $0x218] sm:$0xff]  ;;  %v759_v42 = vld [vmem:[#allocation7 + $0x2a8] sm:$0xff]  ;;  %v760_v43 = vld [vmem:[#allocation7 + $0x2b0] sm:$0xff] }
 0x155   :  { %695 = vmatpush.msra.mxu0 %v265_v48  ;;  %v762_v48 = vld [vmem:[#allocation7 + $0x2c0] sm:$0xff] }
 0x156   :  { %1884 = vmatmul.msk.f32.vlgmr.msra.gmra.mxu0 %vm661_vm2, %v619_v49 }
 0x157   :  { %984 = vmatpush.msrb.mxu0 %v418_v56 }
 0x158   :  { %v586_v36 = vpop.f32.mrf.mxu1 }
 0x159   :  { %985 = vmatpush.msrb.mxu0 %v415_v58 }
 0x15a   :  { %v607_v12 = vpop.f32.mrf.mxu3 }
 0x15b   :  { %v374_v62 = vpop.f32.mrf.mxu2  ;;  %v608_v14 = vadd.f32 %v607_v12, %v2214_v19  ;;  %v596_v19 = vadd.f32 %v2261_v13, %v2243_v55  ;;  %v584_v55 = vadd.f32 %v583_v15, %v2227_v37  ;;  %v752_v37 = vld [vmem:[#allocation7 + $0x270] sm:$0xff] }
 0x15c   :  { %v375_v63 = vadd.f32 %v374_v62, %v2233_v46 }
 0x15e   :  { %725 = vmatpush.msra.mxu1 %v375_v63  ;;  %1885 = vmatmul.msk.f32.gmra.mxu0 %vm661_vm2, %v620_v0 }
 0x160   :  { %726 = vmatpush.msra.mxu1 %v372_v5 }
 0x162   :  { %727 = vmatpush.msra.mxu1 %v369_v61  ;;  %v610_v20 = vpop.f32.mrf.mxu3 }
 0x163   :  { %v611_v7 = vadd.f32 %v610_v20, %v2212_v17  ;;  %v599_v17 = vadd.f32 %v2267_v21, %v2219_v27  ;;  %v587_v27 = vadd.f32 %v586_v36, %v2245_v60  ;;  %v751_v60 = vld [vmem:[#allocation7 + $0x268] sm:$0xff] }
 0x164   :  { %728 = vmatpush.msra.mxu1 %v366_v59 }
 0x166   :  { %729 = vmatpush.msra.mxu1 %v363_v57  ;;  %1886 = vmatmul.msk.f32.gmra.mxu0 %vm661_vm2, %v621_v24 }
 0x168   :  { %730 = vmatpush.msra.mxu1 %v360_v28  ;;  %v2331_v28 = vpop.permute.xlu2 %825 }
 0x169   :  { %1890 = vmatmul.msk.f32.vlgmr.msra.gmra.mxu1 %vm661_vm2, %v619_v49  ;;  %v763_v49 = vld [vmem:[#allocation7 + $0x2c8] sm:$0xff] }
 0x16a   :  { %v613_v46 = vpop.f32.mrf.mxu3 }
 0x16b   :  { %v614_v52 = vadd.f32 %v613_v46, %v2231_v44  ;;  %v577_v44 = vpop.f32.mrf.mxu0 }
 0x16c   :  { %v578_v13 = vadd.f32 %v577_v44, %v2249_v2  ;;  %v755_v2 = vld [vmem:[#allocation7 + $0x288] sm:$0xff] }
 0x16e   :  { %1887 = vmatmul.msk.f32.gmra.mxu0 %vm661_vm2, %v622_v47 }
 0x171   :  { %1891 = vmatmul.msk.f32.gmra.mxu1 %vm661_vm2, %v620_v0 }
 0x172   :  { %v616_v51 = vpop.f32.mrf.mxu3 }
 0x173   :  { %v617_v8 = vadd.f32 %v616_v51, %v2206_v9  ;;  %v602_v9 = vadd.f32 %v2269_v29, %v2217_v25  ;;  %v950_v25 = vld [vmem:[#allocation7 + $0x340] sm:$0xff]  ;;  %v590_v29 = vadd.f32 %v2247_v1, %v2225_v33  ;;  %v580_v21 = vpop.f32.mrf.mxu0 }
 0x174   :  { %v581_v32 = vadd.f32 %v580_v21, %v2229_v40  ;;  %v750_v33 = vld [vmem:[#allocation7 + $0x260] sm:$0xff]  ;;  %v753_v40 = vld [vmem:[#allocation7 + $0x278] sm:$0xff] }
 0x175   :  { %893 = vmatpush.msrb.mxu2 %v617_v8  ;;  %v754_v1 = vld [vmem:[#allocation7 + $0x280] sm:$0xff] }
 0x176   :  { %1888 = vmatmul.msk.f32.gmra.mxu0 %vm661_vm2, %v623_v22 }
 0x177   :  { %894 = vmatpush.msrb.mxu2 %v614_v52 }
 0x179   :  { %1892 = vmatmul.msk.f32.gmra.mxu1 %vm661_vm2, %v621_v24  ;;  %895 = vmatpush.msrb.mxu2 %v611_v7 }
 0x17b   :  { %896 = vmatpush.msrb.mxu2 %v608_v14 }
 0x17d   :  { %897 = vmatpush.msrb.mxu2 %v605_v30  ;;  %v2333_v30 = vpop.permute.xlu2 %820 }
 0x17e   :  { %1889 = vmatmul.msk.f32.gmra.mxu0 %vm661_vm2, %v624_v31 }
 0x17f   :  { %898 = vmatpush.msrb.mxu2 %v602_v9 }
 0x181   :  { %1893 = vmatmul.msk.f32.gmra.mxu1 %vm661_vm2, %v622_v47  ;;  %899 = vmatpush.msrb.mxu2 %v599_v17 }
 0x183   :  { %900 = vmatpush.msrb.mxu2 %v596_v19 }
 0x185   :  { %901 = vmatpush.msrb.mxu2 %v593_v50 }
 0x186   :  { %1910 = vmatmul.msk.f32.vlgmr.msrb.gmra.mxu0 %vm228_vm1, %v950_v25 }
 0x187   :  { %902 = vmatpush.msrb.mxu2 %v590_v29 }
 0x189   :  { %1894 = vmatmul.msk.f32.gmra.mxu1 %vm661_vm2, %v623_v22  ;;  %903 = vmatpush.msrb.mxu2 %v587_v27 }
 0x18b   :  { %904 = vmatpush.msrb.mxu2 %v584_v55 }
 0x18d   :  { %905 = vmatpush.msrb.mxu2 %v581_v32  ;;  %v796_v32 = vpop.permute.xlu2 %795 }
 0x18e   :  { %1911 = vmatmul.msk.f32.gmra.mxu0 %vm228_vm1, %v951_v6 }
 0x18f   :  { %906 = vmatpush.msrb.mxu2 %v578_v13 }
 0x190   :  { %1896 = vmatmul.msk.f32.vlgmr.msrb.gmra.mxu2 %vm848_vm3, %v750_v33 }
 0x191   :  { %1895 = vmatmul.msk.f32.gmra.mxu1 %vm661_vm2, %v624_v31 }
 0x198   :  { %1897 = vmatmul.msk.f32.gmra.mxu2 %vm848_vm3, %v751_v60 }
 0x1a0   :  { %1898 = vmatmul.msk.f32.gmra.mxu2 %vm848_vm3, %v752_v37 }
 0x1a8   :  { %1899 = vmatmul.msk.f32.gmra.mxu2 %vm848_vm3, %v753_v40 }
 0x1b0   :  { %1900 = vmatmul.msk.f32.gmra.mxu2 %vm848_vm3, %v754_v1 }
 0x1b8   :  { %1901 = vmatmul.msk.f32.gmra.mxu2 %vm848_vm3, %v755_v2 }
 0x1c0   :  { %1902 = vmatmul.msk.f32.gmra.mxu2 %vm848_vm3, %v756_v38 }
 0x1c8   :  { %1903 = vmatmul.msk.f32.gmra.mxu2 %vm848_vm3, %v757_v39 }
 0x1d0   :  { %1904 = vmatmul.msk.f32.gmra.mxu2 %vm848_vm3, %v758_v41 }
 0x1d3   :  { %v697_v53 = vpop.f32.mrf.mxu0 }
 0x1d4   :  { %v2346_v38 = vadd.f32 %v697_v53, %v2257_v10 }
 0x1d8   :  { %1905 = vmatmul.msk.f32.gmra.mxu2 %vm848_vm3, %v759_v42  ;;  %v2348_v42 = vpop.permute.xlu1 %653 }
 0x1db   :  { %v700_v54 = vpop.f32.mrf.mxu0 }
 0x1e0   :  { %1906 = vmatmul.msk.f32.gmra.mxu2 %vm848_vm3, %v760_v43 }
 0x1e3   :  { %v703_v56 = vpop.f32.mrf.mxu0 }
 0x1e4   :  { %v704_v62 = vadd.f32 %v703_v56, %v2259_v11 }
 0x1e6   :  { %v732_v58 = vpop.f32.mrf.mxu1 }
 0x1e7   :  { %v733_v63 = vadd.f32 %v732_v58, %v2257_v10  ;;  %v2356_v10 = vadd.f32 %v700_v54, %v2251_v3 }
 0x1e8   :  { %1907 = vmatmul.msk.f32.gmra.mxu2 %vm848_vm3, %v761_v45 }
 0x1e9   :  { %v1179_v0 = vmul.f32 %v733_v63, %v704_v62 }
 0x1eb   :  { %v1180_v61 = vrot.slane %v1179_v0, 4 }
 0x1ed   :  { %v1181_v59 = vadd.f32 %v1180_v61, %v1179_v0 }
 0x1ee   :  { %v735_v14 = vpop.f32.mrf.mxu1 }
 0x1ef   :  { %v1182_v57 = vrot.slane %v1181_v59, 2  ;;  %v736_v29 = vadd.f32 %v735_v14, %v2251_v3 }
 0x1f0   :  { %1908 = vmatmul.msk.f32.gmra.mxu2 %vm848_vm3, %v762_v48  ;;  %v811_v48 = vpop.permute.xlu2 %810 }
 0x1f1   :  { %v1183_v47 = vadd.f32 %v1182_v57, %v1181_v59 }
 0x1f3   :  { %v1184_v52 = vrot.slane %v1183_v47, 1 }
 0x1f5   :  { %v1185_v31 = vadd.f32 %v1184_v52, %v1183_v47 }
 0x1f6   :  { %v738_v27 = vpop.f32.mrf.mxu1 }
 0x1f7   :  { %v1186_v19 = vmul.f32 0.35355338, %v1185_v31  ;;  %v739_v1 = vadd.f32 %v738_v27, %v2259_v11  ;;  %v801_v31 = vpop.permute.xlu1 %800 }
 0x1f8   :  { %1909 = vmatmul.msk.f32.gmra.mxu2 %vm848_vm3, %v763_v49 }
 0x1f9   :  { %v997_v56 = vmul.f32 %v739_v1, %v2346_v38 }
 0x1fe   :  { %v741_v39 = vpop.f32.mrf.mxu1 }
 0x1ff   :  { %v742_v11 = vadd.f32 %v741_v39, %v2253_v4 }
 0x201   :  { %v1027_v47 = vmul.f32 %v742_v11, %v2356_v10 }
 0x213   :  { %v908_v12 = vpop.f32.mrf.mxu2 }
 0x214   :  { %v2351_v43 = vadd.f32 %v908_v12, %v2265_v18 }
 0x216   :  { %v1096_v53 = vmul.f32 %v2351_v43, %v739_v1 }
 0x21b   :  { %v2328_v5 = vpop.f32.mrf.mxu2 }
 0x223   :  { %v914_v20 = vpop.f32.mrf.mxu2 }
 0x224   :  { %v915_v24 = vadd.f32 %v914_v20, %v2273_v35  ;;  %v706_v35 = vpop.f32.mrf.mxu0  ;;  %v998_v20 = vrot.slane %v997_v56, 4 }
 0x225   :  { %v2338_v25 = vadd.f32 %v706_v35, %v2253_v4  ;;  %v2362_v4 = vadd.f32 %v2328_v5, %v2263_v16 }
 0x226   :  { %v1187_v46 = vmul.f32 %v915_v24, %v733_v63 }
 0x227   :  { %v1209_v33 = vmul.f32 %v736_v29, %v2338_v25  ;;  %v1126_v16 = vmul.f32 %v2362_v4, %v742_v11 }
 0x228   :  { %v1188_v51 = vrot.slane %v1187_v46, 4 }
 0x229   :  { %v1210_v40 = vrot.slane %v1209_v33, 4  ;;  %v1127_v39 = vrot.slane %v1126_v16, 4 }
 0x22a   :  { %v1189_v8 = vadd.f32 %v1188_v51, %v1187_v46 }
 0x22b   :  { %v917_v22 = vpop.f32.mrf.mxu2  ;;  %v1211_v49 = vadd.f32 %v1210_v40, %v1209_v33 }
 0x22c   :  { %v1190_v7 = vrot.slane %v1189_v8, 2  ;;  %v918_v60 = vadd.f32 %v917_v22, %v796_v32  ;;  %v709_v46 = vpop.f32.mrf.mxu0  ;;  %v1097_v22 = vrot.slane %v1096_v53, 4 }
 0x22d   :  { %v1212_v12 = vrot.slane %v1211_v49, 2 }
 0x22e   :  { %v1191_v15 = vadd.f32 %v1190_v7, %v1189_v8  ;;  %v1217_v2 = vmul.f32 %v918_v60, %v736_v29  ;;  %v2365_v7 = vadd.f32 %v709_v46, %v2348_v42  ;;  %v1098_v29 = vadd.f32 %v1097_v22, %v1096_v53 }
 0x22f   :  { %v1213_v52 = vadd.f32 %v1212_v12, %v1211_v49  ;;  %v1128_v12 = vadd.f32 %v1127_v39, %v1126_v16 }
 0x230   :  { %v1192_v9 = vrot.slane %v1191_v15, 1  ;;  %v1218_v58 = vrot.slane %v1217_v2, 4 }
 0x232   :  { %v1193_v44 = vadd.f32 %v1192_v9, %v1191_v15  ;;  %v1219_v57 = vadd.f32 %v1218_v58, %v1217_v2  ;;  %v1028_v9 = vrot.slane %v1027_v47, 4  ;;  %v1214_v2 = vrot.slane %v1213_v52, 1 }
 0x233   :  { %v2335_v17 = vpop.f32.mrf.mxu2 }
 0x234   :  { %v1194_v50 = vmul.f32 0.35355338, %v1193_v44  ;;  %v2370_v5 = vadd.f32 %v2335_v17, %v801_v31  ;;  %v1029_v58 = vadd.f32 %v1028_v9, %v1027_v47 }
 0x236   :  { %v1195_v36 = vmax.f32 %v1186_v19, %v1194_v50  ;;  %v1030_v47 = vrot.slane %v1029_v58, 2 }
 0x238   :  { %v1196_v21 = vsub.f32 %v1186_v19, %v1195_v36  ;;  %v1199_v55 = vsub.f32 %v1194_v50, %v1195_v36 }
 0x23a   :  { %v1197_v6 = vmul.f32 1.442695, %v1196_v21  ;;  %v1200_v13 = vmul.f32 1.442695, %v1199_v55 }
 0x23b   :  { %v2342_v37 = vpop.f32.mrf.mxu2 }
 0x23c   :  { %1963 = vpow2.f32 %v1197_v6 }
 0x23d   :  { %1965 = vpow2.f32 %v1200_v13 }
 0x242   :  { %v1964_v41 = vpop.eup %1963 }
 0x243   :  { %v1966_v45 = vpop.eup %1965  ;;  %v926_v63 = vpop.f32.mrf.mxu2 }
 0x244   :  { %v1202_v0 = vadd.f32 %v1966_v45, %v1964_v41  ;;  %v927_v61 = vadd.f32 %v926_v63, %v811_v48 }
 0x246   :  { %1967 = vrcp.f32 %v1202_v0  ;;  %v1262_v59 = vmul.f32 %v927_v61, %v704_v62  ;;  %v1270_v18 = vmul.f32 %v927_v61, %v915_v24  ;;  %v999_v62 = vadd.f32 %v998_v20, %v997_v56 }
 0x247   :  { %v1220_v24 = vrot.slane %v1219_v57, 2 }
 0x248   :  { %v1263_v51 = vrot.slane %v1262_v59, 4  ;;  %v1271_v8 = vrot.slane %v1270_v18, 4 }
 0x249   :  { %v1221_v32 = vadd.f32 %v1220_v24, %v1219_v57 }
 0x24a   :  { %v1264_v3 = vadd.f32 %v1263_v51, %v1262_v59  ;;  %v1272_v54 = vadd.f32 %v1271_v8, %v1270_v18  ;;  %v1215_v18 = vadd.f32 %v1214_v2, %v1213_v52 }
 0x24b   :  { %v929_v14 = vpop.f32.mrf.mxu2  ;;  %v1222_v63 = vrot.slane %v1221_v32, 1 }
 0x24c   :  { %v1968_v15 = vpop.eup %1967  ;;  %v1265_v44 = vrot.slane %v1264_v3, 2  ;;  %v1273_v19 = vrot.slane %v1272_v54, 2  ;;  %v930_v35 = vadd.f32 %v929_v14, %v2271_v34  ;;  %v1216_v9 = vmul.f32 0.35355338, %v1215_v18 }
 0x24d   :  { %v1206_v50 = vmul.f32 %v1968_v15, %v1966_v45  ;;  %v1204_v36 = vmul.f32 %v1968_v15, %v1964_v41  ;;  %v1000_v41 = vrot.slane %v999_v62, 2 }
 0x24e   :  { %v1266_v27 = vadd.f32 %v1265_v44, %v1264_v3  ;;  %v1274_v21 = vadd.f32 %v1273_v19, %v1272_v54  ;;  %v1292_v55 = vmul.f32 %v930_v35, %v2338_v25  ;;  %v1300_v13 = vmul.f32 %v930_v35, %v918_v60 }
 0x24f   :  { %v1207_v6 = vmul.f32 %v1206_v50, %v2370_v5  ;;  %v1205_v33 = vmul.f32 %v1204_v36, %v2365_v7  ;;  %v1099_v25 = vrot.slane %v1098_v29, 2  ;;  %v1001_v22 = vadd.f32 %v1000_v41, %v999_v62 }
 0x250   :  { %v1267_v40 = vrot.slane %v1266_v27, 1  ;;  %v1275_v34 = vrot.slane %v1274_v21, 1  ;;  %v1293_v1 = vrot.slane %v1292_v55, 4  ;;  %v1301_v17 = vrot.slane %v1300_v13, 4 }
 0x251   :  { %v2375_v48 = vadd.f32 %v1207_v6, %v1205_v33  ;;  %v1223_v3 = vadd.f32 %v1222_v63, %v1221_v32  ;;  %v1100_v24 = vadd.f32 %v1099_v25, %v1098_v29  ;;  %v1129_v19 = vrot.slane %v1128_v12, 2 }
 0x252   :  { %v1268_v45 = vadd.f32 %v1267_v40, %v1266_v27  ;;  %v1276_v49 = vadd.f32 %v1275_v34, %v1274_v21  ;;  %v1294_v56 = vadd.f32 %v1293_v1, %v1292_v55  ;;  %v1302_v11 = vadd.f32 %v1301_v17, %v1300_v13 }
 0x253   :  { %v932_v0 = vpop.f32.mrf.mxu2  ;;  %v1002_v36 = vrot.slane %v1001_v22, 1  ;;  %v2380_v27 = vmul.f32 0.35355338, %v1223_v3  ;;  %v1101_v21 = vrot.slane %v1100_v24, 1  ;;  %v1130_v33 = vadd.f32 %v1129_v19, %v1128_v12 }
 0x254   :  { %v1269_v60 = vmul.f32 0.35355338, %v1268_v45  ;;  %v1277_v61 = vmul.f32 0.35355338, %v1276_v49  ;;  %v1295_v53 = vrot.slane %v1294_v56, 2  ;;  %v933_v59 = vadd.f32 %v932_v0, %v2333_v30 }
 0x255   :  { %v1303_v20 = vrot.slane %v1302_v11, 2  ;;  %v1003_v2 = vadd.f32 %v1002_v36, %v1001_v22  ;;  %v1225_v39 = vmax.f32 %v1216_v9, %v2380_v27  ;;  %v1131_v0 = vrot.slane %v1130_v33, 1 }
 0x256   :  { %v1278_v57 = vmax.f32 %v1269_v60, %v1277_v61  ;;  %v1296_v46 = vadd.f32 %v1295_v53, %v1294_v56  ;;  %v1005_v51 = vmul.f32 %v933_v59, %v2346_v38  ;;  %v1104_v8 = vmul.f32 %v933_v59, %v2351_v43 }
 0x257   :  { %v1304_v54 = vadd.f32 %v1303_v20, %v1302_v11  ;;  %v1031_v38 = vadd.f32 %v1030_v47, %v1029_v58  ;;  %v1102_v58 = vadd.f32 %v1101_v21, %v1100_v24  ;;  %v1004_v59 = vmul.f32 0.35355338, %v1003_v2 }
 0x258   :  { %v1279_v14 = vsub.f32 %v1269_v60, %v1278_v57  ;;  %v1282_v15 = vsub.f32 %v1277_v61, %v1278_v57  ;;  %v1006_v31 = vrot.slane %v1005_v51, 4  ;;  %v1297_v44 = vrot.slane %v1296_v46, 1 }
 0x259   :  { %v1305_v30 = vrot.slane %v1304_v54, 1  ;;  %v1105_v52 = vrot.slane %v1104_v8, 4  ;;  %v1032_v41 = vrot.slane %v1031_v38, 1  ;;  %v1132_v3 = vadd.f32 %v1131_v0, %v1130_v33 }
 0x25a   :  { %v1280_v35 = vmul.f32 1.442695, %v1279_v14  ;;  %v1283_v16 = vmul.f32 1.442695, %v1282_v15  ;;  %v1007_v50 = vadd.f32 %v1006_v31, %v1005_v51  ;;  %v1298_v32 = vadd.f32 %v1297_v44, %v1296_v46 }
 0x25b   :  { %v1106_v43 = vadd.f32 %v1105_v52, %v1104_v8  ;;  %v935_v62 = vpop.f32.mrf.mxu2  ;;  %v1306_v6 = vadd.f32 %v1305_v30, %v1304_v54  ;;  %v1033_v12 = vadd.f32 %v1032_v41, %v1031_v38  ;;  %v1103_v51 = vmul.f32 0.35355338, %v1102_v58 }
 0x25c   :  { %1969 = vpow2.f32 %v1280_v35  ;;  %v1008_v29 = vrot.slane %v1007_v50, 2  ;;  %v936_v55 = vadd.f32 %v935_v62, %v2331_v28  ;;  %v1299_v28 = vmul.f32 0.35355338, %v1298_v32 }
 0x25d   :  { %1971 = vpow2.f32 %v1283_v16  ;;  %v1107_v13 = vrot.slane %v1106_v43, 2  ;;  %v1307_v25 = vmul.f32 0.35355338, %v1306_v6  ;;  %v1229_v31 = vsub.f32 %v2380_v27, %v1225_v39 }
 0x25e   :  { %v1009_v40 = vadd.f32 %v1008_v29, %v1007_v50  ;;  %v1035_v34 = vmul.f32 %v936_v55, %v2356_v10  ;;  %v1134_v1 = vmul.f32 %v936_v55, %v2362_v4  ;;  %v1226_v4 = vsub.f32 %v1216_v9, %v1225_v39 }
 0x25f   :  { %v1108_v17 = vadd.f32 %v1107_v13, %v1106_v43  ;;  %v1308_v8 = vmax.f32 %v1299_v28, %v1307_v25  ;;  %v1034_v21 = vmul.f32 0.35355338, %v1033_v12  ;;  %v1133_v29 = vmul.f32 0.35355338, %v1132_v3 }
 0x260   :  { %v1010_v45 = vrot.slane %v1009_v40, 1  ;;  %v1036_v49 = vrot.slane %v1035_v34, 4  ;;  %v1135_v56 = vrot.slane %v1134_v1, 4  ;;  %v1227_v15 = vmul.f32 1.442695, %v1226_v4 }
 0x261   :  { %v1109_v63 = vrot.slane %v1108_v17, 1  ;;  %v1309_v35 = vsub.f32 %v1299_v28, %v1308_v8  ;;  %v1230_v55 = vmul.f32 1.442695, %v1229_v31  ;;  %v1312_v32 = vsub.f32 %v1307_v25, %v1308_v8  ;;  %v836_v31 = vpop.permute.xlu0 %835 }
 0x262   :  { %v1970_v11 = vpop.eup %1969  ;;  %v1011_v60 = vadd.f32 %v1010_v45, %v1009_v40  ;;  %v1037_v61 = vadd.f32 %v1036_v49, %v1035_v34  ;;  %v1136_v53 = vadd.f32 %v1135_v56, %v1134_v1 }
 0x263   :  { %v1972_v10 = vpop.eup %1971  ;;  %v1110_v18 = vadd.f32 %v1109_v63, %v1108_v17  ;;  %v1310_v40 = vmul.f32 1.442695, %v1309_v35  ;;  %v1313_v17 = vmul.f32 1.442695, %v1312_v32 }
 0x264   :  { %v1012_v20 = vmul.f32 0.35355338, %v1011_v60  ;;  %v1038_v57 = vrot.slane %v1037_v61, 2  ;;  %v1137_v46 = vrot.slane %v1136_v53, 2  ;;  %v1285_v47 = vadd.f32 %v1972_v10, %v1970_v11 }
 0x265   :  { %v1111_v22 = vmul.f32 0.35355338, %v1110_v18 }
 0x266   :  { %v1013_v54 = vmax.f32 %v1004_v59, %v1012_v20  ;;  %v1039_v24 = vadd.f32 %v1038_v57, %v1037_v61  ;;  %v1138_v14 = vadd.f32 %v1137_v46, %v1136_v53  ;;  %1973 = vrcp.f32 %v1285_v47  ;;  %v659_v47 = vpop.permute.xlu2 %658 }
 0x267   :  { %v1112_v44 = vmax.f32 %v1103_v51, %v1111_v22  ;;  %1975 = vpow2.f32 %v1227_v15 }
 0x268   :  { %v1014_v30 = vsub.f32 %v1004_v59, %v1013_v54  ;;  %v1017_v9 = vsub.f32 %v1012_v20, %v1013_v54  ;;  %v1040_v52 = vrot.slane %v1039_v24, 1  ;;  %v1139_v19 = vrot.slane %v1138_v14, 1 }
 0x269   :  { %v1113_v16 = vsub.f32 %v1103_v51, %v1112_v44  ;;  %v1116_v50 = vsub.f32 %v1111_v22, %v1112_v44  ;;  %v938_v51 = vpop.f32.mrf.mxu2 }
 0x26a   :  { %v1015_v36 = vmul.f32 1.442695, %v1014_v30  ;;  %v1018_v38 = vmul.f32 1.442695, %v1017_v9  ;;  %v1041_v43 = vadd.f32 %v1040_v52, %v1039_v24  ;;  %v1140_v62 = vadd.f32 %v1139_v19, %v1138_v14 }
 0x26b   :  { %v1114_v6 = vmul.f32 1.442695, %v1113_v16  ;;  %v1117_v34 = vmul.f32 1.442695, %v1116_v50 }
 0x26c   :  { %v1042_v27 = vmul.f32 0.35355338, %v1041_v43  ;;  %v1141_v13 = vmul.f32 0.35355338, %v1140_v62  ;;  %v1974_v33 = vpop.eup %1973  ;;  %1977 = vpow2.f32 %v1015_v36 }
 0x26d   :  { %1979 = vpow2.f32 %v1018_v38  ;;  %v1287_v39 = vmul.f32 %v1974_v33, %v1970_v11  ;;  %v1289_v41 = vmul.f32 %v1974_v33, %v1972_v10  ;;  %v1976_v63 = vpop.eup %1975 }
 0x26e   :  { %v1043_v1 = vmax.f32 %v1034_v21, %v1042_v27  ;;  %v1142_v2 = vmax.f32 %v1133_v29, %v1141_v13  ;;  %1981 = vpow2.f32 %v1230_v55  ;;  %v831_v38 = vpop.permute.xlu2 %830 }
 0x26f   :  { %1983 = vpow2.f32 %v1114_v6  ;;  %v1288_v28 = vmul.f32 %v1287_v39, %v2365_v7  ;;  %v1290_v25 = vmul.f32 %v1289_v41, %v2370_v5  ;;  %v744_v5 = vpop.f32.mrf.mxu1 }
 0x270   :  { %v1044_v45 = vsub.f32 %v1034_v21, %v1043_v1  ;;  %v1047_v49 = vsub.f32 %v1042_v27, %v1043_v1  ;;  %v1143_v56 = vsub.f32 %v1133_v29, %v1142_v2  ;;  %v1146_v58 = vsub.f32 %v1141_v13, %v1142_v2  ;;  %v712_v27 = vpop.f32.mrf.mxu0 }
 0x271   :  { %1985 = vpow2.f32 %v1117_v34  ;;  %v2389_v53 = vadd.f32 %v1290_v25, %v1288_v28  ;;  %v941_v19 = vpop.f32.mrf.mxu2  ;;  %v745_v43 = vadd.f32 %v744_v5, %v2348_v42  ;;  %v939_v29 = vadd.f32 %v938_v51, %v831_v38 }
 0x272   :  { %1987 = vpow2.f32 %v1310_v40  ;;  %v1045_v0 = vmul.f32 1.442695, %v1044_v45  ;;  %v1048_v60 = vmul.f32 1.442695, %v1047_v49  ;;  %v1978_v61 = vpop.eup %1977  ;;  %v1144_v11 = vmul.f32 1.442695, %v1143_v56  ;;  %v806_v45 = vpop.permute.xlu0 %805 }
 0x273   :  { %1989 = vpow2.f32 %v1313_v17  ;;  %v1980_v10 = vpop.eup %1979  ;;  %v1147_v4 = vmul.f32 1.442695, %v1146_v58  ;;  %v942_v55 = vadd.f32 %v941_v19, %v836_v31  ;;  %v713_v28 = vadd.f32 %v712_v27, %v659_v47 }
 0x274   :  { %1991 = vpow2.f32 %v1045_v0  ;;  %v1982_v59 = vpop.eup %1981  ;;  %v1020_v7 = vadd.f32 %v1980_v10, %v1978_v61  ;;  %v924_v25 = vadd.f32 %v2342_v37, %v806_v45 }
 0x275   :  { %v1984_v18 = vpop.eup %1983  ;;  %1993 = vpow2.f32 %v1048_v60  ;;  %v1232_v46 = vadd.f32 %v1982_v59, %v1976_v63 }
 0x276   :  { %1995 = vpow2.f32 %v1144_v11 }
 0x277   :  { %v1986_v12 = vpop.eup %1985  ;;  %1997 = vpow2.f32 %v1147_v4  ;;  %v747_v9 = vpop.f32.mrf.mxu1 }
 0x278   :  { %v1988_v20 = vpop.eup %1987  ;;  %v1119_v22 = vadd.f32 %v1986_v12, %v1984_v18  ;;  %1999 = vrcp.f32 %v1020_v7  ;;  %v748_v62 = vadd.f32 %v747_v9, %v659_v47  ;;  %v987_v51 = vpop.f32.mrf.mxu0 }
 0x279   :  { %v1990_v57 = vpop.eup %1989  ;;  %2001 = vrcp.f32 %v1232_v46 }
 0x27a   :  { %v1992_v8 = vpop.eup %1991  ;;  %v1315_v54 = vadd.f32 %v1990_v57, %v1988_v20  ;;  %2003 = vrcp.f32 %v1119_v22  ;;  %v944_v22 = vpop.f32.mrf.mxu2 }
 0x27b   :  { %v1994_v3 = vpop.eup %1993 }
 0x27c   :  { %v1996_v24 = vpop.eup %1995  ;;  %v1050_v14 = vadd.f32 %v1994_v3, %v1992_v8 }
 0x27d   :  { %v1998_v15 = vpop.eup %1997 }
 0x27e   :  { %2005 = vrcp.f32 %v1050_v14  ;;  %v1149_v44 = vadd.f32 %v1998_v15, %v1996_v24  ;;  %v2000_v30 = vpop.eup %1999 }
 0x27f   :  { %2007 = vrcp.f32 %v1315_v54  ;;  %v2002_v52 = vpop.eup %2001  ;;  %v1024_v16 = vmul.f32 %v2000_v30, %v1980_v10  ;;  %v1022_v50 = vmul.f32 %v2000_v30, %v1978_v61 }
 0x280   :  { %2009 = vrcp.f32 %v1149_v44  ;;  %v2004_v35 = vpop.eup %2003  ;;  %v1234_v13 = vmul.f32 %v2002_v52, %v1976_v63  ;;  %v1236_v33 = vmul.f32 %v2002_v52, %v1982_v59  ;;  %v2420_v44 = vpop.permute.xlu0 %1059 }
 0x281   :  { %v1123_v40 = vmul.f32 %v2004_v35, %v1986_v12  ;;  %v1121_v34 = vmul.f32 %v2004_v35, %v1984_v18  ;;  %v1025_v2 = vmul.f32 %v1024_v16, %v939_v29  ;;  %v1023_v41 = vmul.f32 %v1022_v50, %v745_v43  ;;  %v2393_v12 = vld [vmem:[#allocation7 + $0x3a0] sm:$0xff] }
 0x282   :  { %v1235_v10 = vmul.f32 %v1234_v13, %v713_v28  ;;  %v1237_v4 = vmul.f32 %v1236_v33, %v924_v25  ;;  %v947_v14 = vpop.f32.mrf.mxu2  ;;  %v1389_v13 = vld [vmem:[#allocation7 + $0x360] sm:$0xff]  ;;  %v1390_v33 = vld [vmem:[#allocation7 + $0x368] sm:$0xff] }
 0x283   :  { %v1124_v60 = vmul.f32 %v1123_v40, %v939_v29  ;;  %v1122_v11 = vmul.f32 %v1121_v34, %v745_v43  ;;  %v1026_v59 = vadd.f32 %v1025_v2, %v1023_v41  ;;  %v1345_v43 = vld [vmem:[#allocation7 + $0x3c0] sm:$0xff]  ;;  %v1357_v29 = vpop.permute.xlu1 %1356  ;;  %v1391_v40 = vld [vmem:[#allocation7 + $0x370] sm:$0xff]  ;;  %v1392_v34 = vld [vmem:[#allocation7 + $0x378] sm:$0xff] }
 0x284   :  { %v2006_v36 = vpop.eup %2005  ;;  %v1238_v37 = vadd.f32 %v1237_v4, %v1235_v10 }
 0x285   :  { %v2008_v21 = vpop.eup %2007  ;;  %v1052_v32 = vmul.f32 %v2006_v36, %v1992_v8  ;;  %v1054_v6 = vmul.f32 %v2006_v36, %v1994_v3  ;;  %v2415_v8 = vpop.f32.mrf.mxu0 }
 0x286   :  { %v2010_v1 = vpop.eup %2009  ;;  %v1317_v42 = vmul.f32 %v2008_v21, %v1988_v20  ;;  %v1319_v58 = vmul.f32 %v2008_v21, %v1990_v57  ;;  %v1125_v20 = vadd.f32 %v1124_v60, %v1122_v11  ;;  %v2395_v57 = vld [vmem:[#allocation7 + $0x3a8] sm:$0xff] }
 0x287   :  { %v1053_v39 = vmul.f32 %v1052_v32, %v748_v62  ;;  %v1055_v17 = vmul.f32 %v1054_v6, %v942_v55  ;;  %v1151_v49 = vmul.f32 %v2010_v1, %v1996_v24  ;;  %v1153_v56 = vmul.f32 %v2010_v1, %v1998_v15  ;;  %v2417_v24 = vpop.permute.xlu2 %1064 }
 0x288   :  { %v1318_v7 = vmul.f32 %v1317_v42, %v713_v28  ;;  %v1320_v5 = vmul.f32 %v1319_v58, %v924_v25  ;;  %v962_v2 = vpop.permute.xlu0 %961 }
 0x289   :  { %v1056_v0 = vadd.f32 %v1055_v17, %v1053_v39  ;;  %v1152_v61 = vmul.f32 %v1151_v49, %v748_v62  ;;  %v1154_v63 = vmul.f32 %v1153_v56, %v942_v55  ;;  %v1346_v62 = vld [vmem:[#allocation7 + $0x3c8] sm:$0xff]  ;;  %v991_v11 = vadd.f32 %v2415_v8, %v962_v2 }
 0x28a   :  { %v1321_v46 = vadd.f32 %v1320_v5, %v1318_v7 }
 0x28b   :  { %1087 = vmatpush.msra.mxu0 %v1056_v0  ;;  %v1155_v18 = vadd.f32 %v1154_v63, %v1152_v61  ;;  %v1405_v39 = vpop.permute.xlu1 %1404 }
 0x28d   :  { %1088 = vmatpush.msra.mxu0 %v1026_v59  ;;  %1170 = vmatpush.msrb.mxu1 %v1155_v18 }
 0x28e   :  { %1943 = vmatpush.msra.mxu2 %v1155_v18  ;;  %1912 = vmatmul.msk.f32.vlgmr.msra.gmra.mxu0 %vm228_vm1, %v2393_v12 }
 0x28f   :  { %1171 = vmatpush.msrb.mxu1 %v1125_v20  ;;  %1253 = vmatpush.msrb.mxu0 %v1238_v37  ;;  %v1352_v6 = vpop.permute.xlu2 %1351 }
 0x290   :  { %1944 = vmatpush.msra.mxu2 %v1125_v20  ;;  %1914 = vmatmul.msk.f32.vlgmr.msrb.gmra.mxu1 %vm228_vm1, %v2393_v12  ;;  %v1400_v41 = vpop.permute.xlu0 %1399 }
 0x291   :  { %1915 = vmatmul.msk.f32.vlgmr.msra.gmra.mxu2 %vm228_vm1, %v2395_v57  ;;  %1336 = vmatpush.msra.mxu1 %v1321_v46 }
 0x292   :  { %1254 = vmatpush.msrb.mxu0 %v2375_v48 }
 0x293   :  { %1337 = vmatpush.msra.mxu1 %v2389_v53  ;;  %v846_v63 = vpop.permute.xlu1 %845 }
 0x294   :  { %v948_v59 = vadd.f32 %v947_v14, %v846_v63 }
 0x296   :  { %1913 = vmatmul.msk.f32.gmra.mxu0 %vm228_vm1, %v2395_v57 }
 0x297   :  { %v957_v1 = vpop.permute.xlu2 %956 }
 0x298   :  { %1918 = vmatmul.msk.f32.vlgmr.msra.gmra.mxu1 %vm228_vm1, %v2393_v12  ;;  %v988_v49 = vadd.f32 %v987_v51, %v957_v1 }
 0x29e   :  { %1916 = vmatmul.msk.f32.vlgmr.msrb.gmra.mxu0 %vm228_vm1, %v2393_v12 }
 0x29f   :  { %v841_v17 = vpop.permute.xlu2 %840 }
 0x2a0   :  { %1919 = vmatmul.msk.f32.gmra.mxu1 %vm228_vm1, %v2395_v57  ;;  %v945_v56 = vadd.f32 %v944_v22, %v841_v17 }
 0x2a6   :  { %1917 = vmatmul.msk.f32.gmra.mxu0 %vm228_vm1, %v2395_v57 }
 0x30b   :  { %v1090_v48 = vpop.f32.mrf.mxu0 }
 0x30c   :  { %v1091_v38 = vadd.f32 %v1090_v48, %v2420_v44 }
 0x30d   :  { %v1173_v53 = vpop.f32.mrf.mxu1 }
 0x30e   :  { %v1174_v50 = vadd.f32 %v1173_v53, %v2420_v44 }
 0x313   :  { %v1093_v47 = vpop.f32.mrf.mxu0 }
 0x314   :  { %v1176_v19 = vpop.f32.mrf.mxu2  ;;  %v1094_v36 = vadd.f32 %v1093_v47, %v2417_v24 }
 0x315   :  { %v1339_v3 = vpop.f32.mrf.mxu1  ;;  %v1177_v16 = vadd.f32 %v1176_v19, %v2417_v24 }
 0x316   :  { %v1340_v30 = vadd.f32 %v1339_v3, %v2420_v44 }
 0x31b   :  { %v1256_v54 = vpop.f32.mrf.mxu0 }
 0x31c   :  { %v1257_v35 = vadd.f32 %v1256_v54, %v2420_v44 }
 0x31d   :  { %v1342_v15 = vpop.f32.mrf.mxu1 }
 0x31e   :  { %v1343_v31 = vadd.f32 %v1342_v15, %v2417_v24 }
 0x320   :  { %1374 = vmatpush.msra.mxu0 %v1343_v31 }
 0x322   :  { %1375 = vmatpush.msra.mxu0 %v1340_v30 }
 0x323   :  { %v1259_v9 = vpop.f32.mrf.mxu0 }
 0x324   :  { %v1260_v52 = vadd.f32 %v1259_v9, %v2417_v24 }
 0x326   :  { %1376 = vmatpush.msra.mxu0 %v1260_v52 }
 0x328   :  { %1377 = vmatpush.msra.mxu0 %v1257_v35 }
 0x32a   :  { %1378 = vmatpush.msra.mxu0 %v1177_v16 }
 0x32c   :  { %1379 = vmatpush.msra.mxu0 %v1174_v50 }
 0x32e   :  { %1380 = vmatpush.msra.mxu0 %v1094_v36 }
 0x330   :  { %1381 = vmatpush.msra.mxu0 %v1091_v38 }
 0x331   :  { %1920 = vmatmul.msk.f32.vlgmr.msra.gmra.mxu0 %vm1359_vm4, %v1345_v43 }
 0x339   :  { %1921 = vmatmul.msk.f32.gmra.mxu0 %vm1359_vm4, %v1346_v62 }
 0x3ae   :  { %v1383_v21 = vpop.f32.mrf.mxu0 }
 0x3af   :  { %v2433_v27 = vadd.f32 %v1383_v21, %v1352_v6 }
 0x3b6   :  { %v1386_v55 = vpop.f32.mrf.mxu0 }
 0x3b7   :  { %v2431_v32 = vadd.f32 %v1386_v55, %v1357_v29 }
 0x3b9   :  { %1443 = vmatpush.msrb.mxu1 %v2431_v32 }
 0x3bb   :  { %1444 = vmatpush.msrb.mxu1 %v2433_v27 }
 0x3bc   :  { %1922 = vmatmul.msk.f32.vlgmr.msrb.gmra.mxu1 %vm228_vm1, %v1389_v13 }
 0x3c4   :  { %1923 = vmatmul.msk.f32.gmra.mxu1 %vm228_vm1, %v1390_v33 }
 0x3cc   :  { %1924 = vmatmul.msk.f32.gmra.mxu1 %vm228_vm1, %v1391_v40 }
 0x3d4   :  { %1925 = vmatmul.msk.f32.gmra.mxu1 %vm228_vm1, %v1392_v34 }
 0x439   :  { %v1446_v45 = vpop.f32.mrf.mxu1 }
 0x43a   :  { %v1447_v42 = vadd.f32 %v1446_v45, %v1400_v41 }
 0x43c   :  { %v1458_v58 = vmul.f32 %v1447_v42, %v988_v49  ;;  %v1509_v28 = vmul.f32 %v1447_v42, %v945_v56  ;;  %v1415_v56 = vpop.permute.xlu0 %1414 }
 0x43e   :  { %v1459_v25 = vrot.slane %v1458_v58, 4  ;;  %v1510_v0 = vrot.slane %v1509_v28, 4 }
 0x440   :  { %v1460_v60 = vadd.f32 %v1459_v25, %v1458_v58  ;;  %v1511_v61 = vadd.f32 %v1510_v0, %v1509_v28  ;;  %v1410_v0 = vpop.permute.xlu1 %1409 }
 0x441   :  { %v1449_v10 = vpop.f32.mrf.mxu1 }
 0x442   :  { %v1461_v4 = vrot.slane %v1460_v60, 2  ;;  %v1512_v18 = vrot.slane %v1511_v61, 2  ;;  %v1450_v7 = vadd.f32 %v1449_v10, %v1405_v39 }
 0x444   :  { %v1462_v5 = vadd.f32 %v1461_v4, %v1460_v60  ;;  %v1513_v20 = vadd.f32 %v1512_v18, %v1511_v61  ;;  %v1472_v37 = vmul.f32 %v1450_v7, %v991_v11  ;;  %v1523_v46 = vmul.f32 %v1450_v7, %v948_v59 }
 0x446   :  { %v1463_v51 = vrot.slane %v1462_v5, 1  ;;  %v1514_v48 = vrot.slane %v1513_v20, 1  ;;  %v1473_v53 = vrot.slane %v1472_v37, 4  ;;  %v1524_v22 = vrot.slane %v1523_v46, 4 }
 0x448   :  { %v1464_v47 = vadd.f32 %v1463_v51, %v1462_v5  ;;  %v1515_v3 = vadd.f32 %v1514_v48, %v1513_v20  ;;  %v1474_v54 = vadd.f32 %v1473_v53, %v1472_v37  ;;  %v1525_v15 = vadd.f32 %v1524_v22, %v1523_v46  ;;  %v1565_v22 = vld [vmem:[#allocation7 + $0x3e8] sm:$0xff] }
 0x449   :  { %v1452_v40 = vpop.f32.mrf.mxu1 }
 0x44a   :  { %v1465_v31 = vmul.f32 0.35355338, %v1464_v47  ;;  %v1516_v30 = vmul.f32 0.35355338, %v1515_v3  ;;  %v1475_v8 = vrot.slane %v1474_v54, 2  ;;  %v1526_v9 = vrot.slane %v1525_v15, 2 }
 0x44b   :  { %v1453_v63 = vadd.f32 %v1452_v40, %v1410_v0  ;;  %v1568_v47 = vld [vmem:[#allocation7 + $0x400] sm:$0xff]  ;;  %v1569_v3 = vld [vmem:[#allocation7 + $0x408] sm:$0xff] }
 0x44c   :  { %v1466_v14 = vsub.f32 %v1465_v31, %v1465_v31  ;;  %v1476_v52 = vadd.f32 %v1475_v8, %v1474_v54  ;;  %v1527_v19 = vadd.f32 %v1526_v9, %v1525_v15  ;;  %v1517_v35 = vsub.f32 %v1516_v30, %v1516_v30  ;;  %v1618_v54 = vpop.permute.xlu2 %1617  ;;  %v1613_v15 = vpop.permute.xlu0 %1612 }
 0x44d   :  { %v1731_v30 = vpop.permute.xlu1 %1730 }
 0x44e   :  { %v1477_v16 = vrot.slane %v1476_v52, 1  ;;  %v1528_v50 = vrot.slane %v1527_v19, 1  ;;  %v1467_v36 = vmul.f32 1.442695, %v1466_v14  ;;  %v1518_v62 = vmul.f32 1.442695, %v1517_v35 }
 0x450   :  { %v1478_v38 = vadd.f32 %v1477_v16, %v1476_v52  ;;  %v1529_v43 = vadd.f32 %v1528_v50, %v1527_v19  ;;  %2011 = vpow2.f32 %v1467_v36 }
 0x451   :  { %2013 = vpow2.f32 %v1518_v62  ;;  %v1455_v41 = vpop.f32.mrf.mxu1 }
 0x452   :  { %v1479_v21 = vmul.f32 0.35355338, %v1478_v38  ;;  %v1530_v29 = vmul.f32 0.35355338, %v1529_v43  ;;  %v1456_v28 = vadd.f32 %v1455_v41, %v1415_v56 }
 0x454   :  { %v1480_v55 = vsub.f32 %v1479_v21, %v1479_v21  ;;  %v1531_v6 = vsub.f32 %v1530_v29, %v1530_v29  ;;  %v1608_v8 = vpop.permute.xlu2 %1607  ;;  %v1726_v14 = vpop.permute.xlu0 %1725 }
 0x455   :  { %v1787_v52 = vpop.permute.xlu1 %1786 }
 0x456   :  { %v1481_v13 = vmul.f32 1.442695, %v1480_v55  ;;  %v1532_v33 = vmul.f32 1.442695, %v1531_v6  ;;  %v2012_v34 = vpop.eup %2011 }
 0x457   :  { %v2014_v1 = vpop.eup %2013 }
 0x458   :  { %2015 = vpow2.f32 %v1481_v13 }
 0x459   :  { %2017 = vpow2.f32 %v1532_v33 }
 0x45a   :  { %2019 = vrcp.f32 %v2012_v34 }
 0x45b   :  { %2021 = vrcp.f32 %v2014_v1 }
 0x45c   :  { %v1603_v35 = vpop.permute.xlu2 %1602  ;;  %v1721_v16 = vpop.permute.xlu0 %1720 }
 0x45d   :  { %v1782_v50 = vpop.permute.xlu1 %1781 }
 0x45e   :  { %v2016_v2 = vpop.eup %2015 }
 0x45f   :  { %v2018_v39 = vpop.eup %2017  ;;  %2023 = vrcp.f32 %v2016_v2 }
 0x460   :  { %2025 = vrcp.f32 %v2018_v39  ;;  %v2020_v17 = vpop.eup %2019 }
 0x461   :  { %v2022_v45 = vpop.eup %2021  ;;  %v1470_v58 = vmul.f32 %v2020_v17, %v2012_v34 }
 0x462   :  { %v1521_v60 = vmul.f32 %v2022_v45, %v2014_v1 }
 0x463   :  { %v1471_v59 = vmul.f32 %v1470_v58, %v1453_v63 }
 0x464   :  { %v1522_v4 = vmul.f32 %v1521_v60, %v1453_v63  ;;  %v1598_v38 = vpop.permute.xlu2 %1597  ;;  %v1716_v43 = vpop.permute.xlu0 %1715 }
 0x465   :  { %v2024_v49 = vpop.eup %2023  ;;  %v1777_v62 = vpop.permute.xlu1 %1776 }
 0x466   :  { %v2026_v42 = vpop.eup %2025  ;;  %v1484_v25 = vmul.f32 %v2024_v49, %v2016_v2 }
 0x467   :  { %v1535_v61 = vmul.f32 %v2026_v42, %v2018_v39 }
 0x468   :  { %v1485_v11 = vmul.f32 %v1484_v25, %v1456_v28 }
 0x469   :  { %v1536_v10 = vmul.f32 %v1535_v61, %v1456_v28 }
 0x46a   :  { %1500 = vmatpush.msra.mxu3 %v1485_v11 }
 0x46b   :  { %1551 = vmatpush.msrb.mxu0 %v1536_v10 }
 0x46c   :  { %1501 = vmatpush.msra.mxu3 %v1471_v59  ;;  %v1593_v29 = vpop.permute.xlu2 %1592  ;;  %v1711_v55 = vpop.permute.xlu0 %1710 }
 0x46d   :  { %1552 = vmatpush.msrb.mxu0 %v1522_v4  ;;  %1926 = vmatmul.msk.f32.vlgmr.msra.gmra.mxu3 %vm228_vm1, %v2393_v12  ;;  %v1772_v13 = vpop.permute.xlu1 %1771 }
 0x46e   :  { %1928 = vmatmul.msk.f32.vlgmr.msrb.gmra.mxu0 %vm228_vm1, %v2393_v12  ;;  %1654 = vmatpush.msrb.mxu3 %v2177_v23 }
 0x470   :  { %1655 = vmatpush.msrb.mxu3 %v2179_v26 }
 0x474   :  { %v1588_v33 = vpop.permute.xlu2 %1587  ;;  %v1706_v34 = vpop.permute.xlu0 %1705 }
 0x475   :  { %1927 = vmatmul.msk.f32.gmra.mxu3 %vm228_vm1, %v2395_v57  ;;  %v1767_v1 = vpop.permute.xlu1 %1766 }
 0x476   :  { %1929 = vmatmul.msk.f32.gmra.mxu0 %vm228_vm1, %v2395_v57  ;;  %v1564_v57 = vld [vmem:[#allocation7 + $0x3e0] sm:$0xff] }
 0x47c   :  { %v1583_v56 = vpop.permute.xlu2 %1582  ;;  %v1701_v25 = vpop.permute.xlu0 %1700 }
 0x47d   :  { %v1762_v11 = vpop.permute.xlu1 %1761 }
 0x4eb   :  { %v1554_v18 = vpop.f32.mrf.mxu0 }
 0x4ec   :  { %v1555_v46 = vadd.f32 %v1554_v18, %v2420_v44 }
 0x4f0   :  { %v1503_v7 = vpop.f32.mrf.mxu3 }
 0x4f1   :  { %v1504_v20 = vadd.f32 %v1503_v7, %v2420_v44  ;;  %v1566_v44 = vld [vmem:[#allocation7 + $0x3f0] sm:$0xff] }
 0x4f3   :  { %v1557_v5 = vpop.f32.mrf.mxu0  ;;  %v1560_v51 = vadd.f32 %v1555_v46, %v1504_v20 }
 0x4f4   :  { %v1558_v12 = vadd.f32 %v1557_v5, %v2417_v24 }
 0x4f5   :  { %v1562_v53 = vmul.f32 0.5, %v1560_v51  ;;  %v1696_v51 = vpop.permute.xlu2 %1695 }
 0x4f8   :  { %v1506_v37 = vpop.f32.mrf.mxu3 }
 0x4f9   :  { %v1507_v23 = vadd.f32 %v1506_v37, %v2417_v24  ;;  %v1567_v24 = vld [vmem:[#allocation7 + $0x3f8] sm:$0xff] }
 0x4fb   :  { %v1561_v26 = vadd.f32 %v1558_v12, %v1507_v23 }
 0x4fd   :  { %v1563_v48 = vmul.f32 0.5, %v1561_v26 }
 0x4ff   :  { %1656 = vmatpush.msrb.mxu3 %v1563_v48 }
 0x501   :  { %1657 = vmatpush.msrb.mxu3 %v1562_v53 }
 0x503   :  { %1658 = vmatpush.msrb.mxu3 %v2431_v32  ;;  %v1570_v32 = vld [vmem:[#allocation7 + $0x410] sm:$0xff] }
 0x505   :  { %1659 = vmatpush.msrb.mxu3 %v2433_v27  ;;  %v1571_v27 = vld [vmem:[#allocation7 + $0x418] sm:$0xff] }
 0x506   :  { %1930 = vmatmul.msk.f32.vlgmr.msrb.gmra.mxu3 %vm661_vm2, %v1564_v57  ;;  %v1757_v57 = vpop.permute.xlu0 %1756 }
 0x50e   :  { %1931 = vmatmul.msk.f32.gmra.mxu3 %vm661_vm2, %v1565_v22 }
 0x516   :  { %1932 = vmatmul.msk.f32.gmra.mxu3 %vm661_vm2, %v1566_v44 }
 0x51e   :  { %1933 = vmatmul.msk.f32.gmra.mxu3 %vm661_vm2, %v1567_v24  ;;  %v1752_v24 = vpop.permute.xlu1 %1751 }
 0x526   :  { %1934 = vmatmul.msk.f32.gmra.mxu3 %vm661_vm2, %v1568_v47 }
 0x52e   :  { %1935 = vmatmul.msk.f32.gmra.mxu3 %vm661_vm2, %v1569_v3 }
 0x536   :  { %1936 = vmatmul.msk.f32.gmra.mxu3 %vm661_vm2, %v1570_v32 }
 0x53e   :  { %1937 = vmatmul.msk.f32.gmra.mxu3 %vm661_vm2, %v1571_v27 }
 0x589   :  { %v1661_v31 = vpop.f32.mrf.mxu3 }
 0x58a   :  { %v1662_v7 = vadd.f32 %v1661_v31, %v1583_v56 }
 0x58c   :  { %v1733_v26 = vmul.f32 %v1696_v51, %v1662_v7 }
 0x58e   :  { %v1789_v3 = vadd.f32 %v1752_v24, %v1733_v26 }
 0x590   :  { %v1797_v27 = vmax.f32 %v1789_v3, 0.0 }
 0x591   :  { %v1664_v9 = vpop.f32.mrf.mxu3 }
 0x592   :  { %v1665_v10 = vadd.f32 %v1664_v9, %v1588_v33 }
 0x594   :  { %v1734_v46 = vmul.f32 %v1701_v25, %v1665_v10 }
 0x596   :  { %v1790_v44 = vadd.f32 %v1757_v57, %v1734_v46 }
 0x598   :  { %v1798_v32 = vmax.f32 %v1790_v44, 0.0 }
 0x599   :  { %v1667_v19 = vpop.f32.mrf.mxu3 }
 0x59a   :  { %v1668_v0 = vadd.f32 %v1667_v19, %v1593_v29 }
 0x59c   :  { %v1735_v5 = vmul.f32 %v1706_v34, %v1668_v0 }
 0x59e   :  { %v1791_v53 = vadd.f32 %v1762_v11, %v1735_v5 }
 0x5a0   :  { %v1799_v47 = vmax.f32 %v1791_v53, 0.0 }
 0x5a1   :  { %v1670_v36 = vpop.f32.mrf.mxu3 }
 0x5a2   :  { %v1671_v42 = vadd.f32 %v1670_v36, %v1598_v38 }
 0x5a4   :  { %v1736_v59 = vmul.f32 %v1711_v55, %v1671_v42 }
 0x5a6   :  { %v1792_v23 = vadd.f32 %v1767_v1, %v1736_v59 }
 0x5a8   :  { %v1800_v22 = vmax.f32 %v1792_v23, 0.0 }
 0x5a9   :  { %v1673_v21 = vpop.f32.mrf.mxu3 }
 0x5aa   :  { %v1674_v41 = vadd.f32 %v1673_v21, %v1603_v35 }
 0x5ac   :  { %v1737_v60 = vmul.f32 %v1716_v43, %v1674_v41 }
 0x5ae   :  { %v1793_v37 = vadd.f32 %v1772_v13, %v1737_v60 }
 0x5b0   :  { %v1801_v48 = vmax.f32 %v1793_v37, 0.0 }
 0x5b1   :  { %v1676_v6 = vpop.f32.mrf.mxu3 }
 0x5b2   :  { %v1677_v39 = vadd.f32 %v1676_v6, %v1608_v8 }
 0x5b4   :  { %v1738_v58 = vmul.f32 %v1721_v16, %v1677_v39 }
 0x5b6   :  { %v1794_v18 = vadd.f32 %v1777_v62, %v1738_v58 }
 0x5b8   :  { %v1802_v12 = vmax.f32 %v1794_v18, 0.0 }
 0x5b9   :  { %v1679_v40 = vpop.f32.mrf.mxu3 }
 0x5ba   :  { %v1680_v2 = vadd.f32 %v1679_v40, %v1613_v15  ;;  %v1810_v15 = vpop.permute.xlu2 %1809 }
 0x5bc   :  { %v1739_v45 = vmul.f32 %v1726_v14, %v1680_v2 }
 0x5be   :  { %v1795_v63 = vadd.f32 %v1782_v50, %v1739_v45 }
 0x5c0   :  { %v1803_v20 = vmax.f32 %v1795_v63, 0.0 }
 0x5c1   :  { %v1682_v17 = vpop.f32.mrf.mxu3 }
 0x5c2   :  { %v1683_v49 = vadd.f32 %v1682_v17, %v1618_v54  ;;  %v1805_v54 = vld [vmem:[#allocation7 + $0x4e0] sm:$0xff] }
 0x5c4   :  { %v1740_v28 = vmul.f32 %v1731_v30, %v1683_v49 }
 0x5c6   :  { %v1796_v61 = vadd.f32 %v1787_v52, %v1740_v28 }
 0x5c8   :  { %v1804_v4 = vmax.f32 %v1796_v61, 0.0 }
 0x5ca   :  { %1823 = vmatpush.msra.mxu0 %v1804_v4 }
 0x5cc   :  { %1824 = vmatpush.msra.mxu0 %v1803_v20 }
 0x5ce   :  { %1825 = vmatpush.msra.mxu0 %v1802_v12 }
 0x5d0   :  { %1826 = vmatpush.msra.mxu0 %v1801_v48 }
 0x5d2   :  { %1827 = vmatpush.msra.mxu0 %v1800_v22 }
 0x5d4   :  { %1828 = vmatpush.msra.mxu0 %v1799_v47 }
 0x5d6   :  { %1829 = vmatpush.msra.mxu0 %v1798_v32 }
 0x5d8   :  { %1830 = vmatpush.msra.mxu0 %v1797_v27 }
 0x5d9   :  { %1938 = vmatmul.msk.f32.vlgmr.msra.gmra.mxu0 %vm1359_vm4, %v1805_v54 }
 0x656   :  { %v1832_v31 = vpop.f32.mrf.mxu0 }
 0x657   :  { %v1833_v30 = vadd.f32 %v1832_v31, %v1810_v15 }
 0x659   :  { %1835 = vst [vmem:[#allocation8] sm:$0xff] %v1833_v30 }
 0x65a   :  { %1846 = dma.vmem_to_hbm [thread:$0]  %s1842_s2, 128, %s1844_s30, [#allocation4]  }
 0x65b   :  { %2127 = dma.done.wait [#allocation4], 128  }
 0x65c   :  { %2128 = vsyncadd [#allocation4], 4294967168 }
 0x65d   :  { %1851 = vsyncpa [#allocation3], 1 }
 0x65e   :  { %1852 = vsyncpa [#allocation6], 1 }
 0x65f   :  { %1853 = vsyncpa [#allocation4], 1 }

</bundles_post_ra>
